<compile_context>
chip_gen: v7x
topology: tpu7x:2x2x1
jax: 0.10.0
libtpu: 0.0.40
codegen_flags: <defaults>
</compile_context>

<pallas_src>
import jax
import jax.numpy as jnp
from jax.experimental import pallas as pl
from jax.experimental.pallas import tpu as pltpu

# ---------------------------------------------------------------------------
# Static architecture config (consistent with the module: net_arch[i] == 32).
# ---------------------------------------------------------------------------
NET_DEPTH = 6                      # total number of Linear layers
HIDDEN = 32
N_HIDDEN = NET_DEPTH - 2           # number of 32->32 hidden layers
IN_DIM = 2
OUT_DIM = 2

# Lane packing: PACK independent batch rows per lane group.
PACK = 8                           # 256-wide hidden matches v6e/v7x 256x256 MXU
H_P = PACK * HIDDEN                # 256  (packed hidden width)
IN_P = PACK * IN_DIM               # 16   (packed input width, before lane pad)
OUT_P = PACK * OUT_DIM             # 16   (packed output width, before lane pad)
LANES = 128                        # lane-dense padded width for x / out tiles

TILE_B_QUANTUM = 512               # keeps TB_P = TILE_B // PACK a multiple of 64
MAX_TILE_B = 8192                  # TB_P = 1024 -> ~1 MiB per live [TB_P,256] f32
                                   # activation; total working set ~9 MiB.


def _choose_tile_b(batch):
    """Adaptive batch tile.

    Big tiles amortize the ~0.35us per-grid-step overhead; we keep >= 2 grid
    steps when the batch allows so ("parallel",) can shard across v7x's two
    TensorCores, and cap the tile for v7x's smaller (64 MiB) VMEM.
    """
    n_q = pl.cdiv(batch, TILE_B_QUANTUM)
    if n_q <= 1:
        return TILE_B_QUANTUM
    return min(MAX_TILE_B, pl.cdiv(n_q, 2) * TILE_B_QUANTUM)


def mlp_kernel(x_ref, w_in_ref, b_in_ref, w_hid_ref, b_hid_ref,
               w_out_ref, b_out_ref, out_ref):
    """Packed MLP forward for one batch tile.

    x_ref:     [TB_P, 128]            8 batch rows packed per row (2 lanes each),
                                      lanes >= 16 are zero padding
    w_in_ref:  [128, H_P]             block-diag(8 x [2, 32]); rows >= 16 zero
    b_in_ref:  [1, H_P]               tiled bias
    w_hid_ref: [N_HIDDEN, H_P, H_P]   block-diag(8 x [32, 32]) per layer
    b_hid_ref: [N_HIDDEN, 1, H_P]
    w_out_ref: [H_P, 128]             block-diag(8 x [32, 2]); cols >= 16 zero
    b_out_ref: [1, 128]               tiled bias, lanes >= 16 zero
    out_ref:   [TB_P, 128]            lanes >= 16 are zero
    """
    # --- First layer on the MXU (padded K=128; pad rows/lanes contribute 0). ---
    h = jnp.dot(x_ref[...], w_in_ref[...], preferred_element_type=jnp.float32)
    h = jnp.maximum(h + b_in_ref[...], 0.0)                    # [TB_P, 256]

    # --- Hidden layers: block-diagonal 256x256 MXU matmuls + bias + ReLU. ---
    # (Shortcut links are provably all-zero -> statically removed.)
    for l in range(N_HIDDEN):                                  # static unroll
        y = jnp.dot(h, w_hid_ref[l], preferred_element_type=jnp.float32)
        h = jnp.maximum(y + b_hid_ref[l], 0.0)                 # [TB_P, 256]

    # --- Output layer (reference loop ReLUs every layer output). ---
    y = jnp.dot(h, w_out_ref[...], preferred_element_type=jnp.float32)
    out_ref[...] = jnp.maximum(y + b_out_ref[...], 0.0)        # [TB_P, 128]


@jax.jit
def simple_net_forward(x, w_in_blk, b_in_blk, w_hid_blk, b_hid_blk,
                       w_out_blk, b_out_blk):
    """x: [B, 2] -> [B, 2]."""
    B = x.shape[0]
    tile_b = _choose_tile_b(B)
    b_pad = pl.cdiv(B, tile_b) * tile_b
    if b_pad != B:
        x = jnp.pad(x, ((0, b_pad - B), (0, 0)))

    # Lane-pack 8 consecutive batch rows into one packed row (row-major reshape
    # is a free bitcast), then zero-pad to 128 lanes so the kernel's input tile
    # is lane-dense (unmasked vld, full-width DMA rows).
    xp = x.reshape(b_pad // PACK, IN_P)                        # [B/8, 16]
    xp = jnp.pad(xp, ((0, 0), (0, LANES - IN_P)))              # [B/8, 128]

    tb_p = tile_b // PACK                                      # packed rows / tile
    n_tiles = b_pad // tile_b
    m_rows = b_pad // PACK

    # Advisory cost estimate for XLA's scheduler around this small call.
    matmul_params = LANES * H_P + N_HIDDEN * H_P * H_P + H_P * LANES
    cost = pl.CostEstimate(
        flops=2 * m_rows * matmul_params,
        transcendentals=0,
        bytes_accessed=4 * (2 * m_rows * LANES        # x in + out
                            + matmul_params           # weights
                            + (N_HIDDEN + 1) * H_P + LANES))  # biases

    out_p = pl.pallas_call(
        mlp_kernel,
        out_shape=jax.ShapeDtypeStruct((m_rows, LANES), jnp.float32),
        grid_spec=pltpu.PrefetchScalarGridSpec(
            num_scalar_prefetch=0,
            grid=(n_tiles,),
            in_specs=[
                pl.BlockSpec((tb_p, LANES), lambda i: (i, 0)),            # x tile
                pl.BlockSpec((LANES, H_P), lambda i: (0, 0)),             # w_in (resident)
                pl.BlockSpec((1, H_P), lambda i: (0, 0)),                 # b_in
                pl.BlockSpec((N_HIDDEN, H_P, H_P), lambda i: (0, 0, 0)),  # w_hid
                pl.BlockSpec((N_HIDDEN, 1, H_P), lambda i: (0, 0, 0)),    # b_hid
                pl.BlockSpec((H_P, LANES), lambda i: (0, 0)),             # w_out
                pl.BlockSpec((1, LANES), lambda i: (0, 0)),               # b_out
            ],
            out_specs=pl.BlockSpec((tb_p, LANES), lambda i: (i, 0)),
        ),
        compiler_params=pltpu.CompilerParams(
            dimension_semantics=("parallel",)),
        cost_estimate=cost,
    )(xp, w_in_blk, b_in_blk, w_hid_blk, b_hid_blk, w_out_blk, b_out_blk)

    # [B/8, 128] -> keep the 16 real packed output lanes -> [B, 2]
    # (row-major reshape unpacks the lane groups).
    return out_p[:, :OUT_P].reshape(b_pad, OUT_DIM)[:B]


# ---------------------------------------------------------------------------
# Parameter construction (deterministic, mimics nn.Linear's U(-1/sqrt(fan_in)))
# ---------------------------------------------------------------------------
def init_params(key):
    keys = jax.random.split(key, 2 * NET_DEPTH)
    ki = iter(keys)

    def linear(k_w, k_b, fan_in, fan_out):
        bound = 1.0 / (fan_in ** 0.5)
        w = jax.random.uniform(k_w, (fan_in, fan_out), jnp.float32, -bound, bound)
        b = jax.random.uniform(k_b, (1, fan_out), jnp.float32, -bound, bound)
        return w, b

    w_in, b_in = linear(next(ki), next(ki), IN_DIM, HIDDEN)
    w_hid_l, b_hid_l = [], []
    for _ in range(N_HIDDEN):
        w, b = linear(next(ki), next(ki), HIDDEN, HIDDEN)
        w_hid_l.append(w)
        b_hid_l.append(b)
    w_hid = jnp.stack(w_hid_l)                       # [N_HIDDEN, 32, 32]
    b_hid = jnp.stack(b_hid_l)                       # [N_HIDDEN, 1, 32]
    w_out, b_out = linear(next(ki), next(ki), HIDDEN, OUT_DIM)
    return w_in, b_in, w_hid, b_hid, w_out, b_out


def pack_params(w_in, b_in, w_hid, b_hid, w_out, b_out):
    """Build block-diagonal (PACK copies) weights, lane-tiled / lane-padded biases."""
    eye = jnp.eye(PACK, dtype=jnp.float32)
    blk = lambda w: jnp.kron(eye, w)                 # block-diagonal PACK copies

    w_in_blk = blk(w_in)                                           # [16, 256]
    w_in_blk = jnp.pad(w_in_blk, ((0, LANES - IN_P), (0, 0)))      # [128, 256]
    b_in_blk = jnp.tile(b_in, (1, PACK))                           # [1, 256]

    w_hid_blk = jnp.stack([blk(w_hid[l]) for l in range(N_HIDDEN)])  # [N,256,256]
    b_hid_blk = jnp.tile(b_hid, (1, 1, PACK))                        # [N,1,256]

    w_out_blk = blk(w_out)                                          # [256, 16]
    w_out_blk = jnp.pad(w_out_blk, ((0, 0), (0, LANES - OUT_P)))    # [256, 128]
    b_out_blk = jnp.pad(jnp.tile(b_out, (1, PACK)),
                        ((0, 0), (0, LANES - OUT_P)))               # [1, 128]
    return w_in_blk, b_in_blk, w_hid_blk, b_hid_blk, w_out_blk, b_out_blk


if __name__ == "__main__":
    key = jax.random.PRNGKey(0)
    k_x, k_p = jax.random.split(key)

    B = 256                                          # small test batch (1 tile)
    x = jax.random.normal(k_x, (B, IN_DIM), jnp.float32)

    raw = init_params(k_p)
    packed = pack_params(*raw)

    out = simple_net_forward(x, *packed)
    out = jax.block_until_ready(out)

    # Pure-JAX reference (shortcut links are all zero -> contribute nothing).
    w_in, b_in, w_hid, b_hid, w_out, b_out = raw
    h = jnp.maximum(x @ w_in + b_in, 0.0)
    for l in range(N_HIDDEN):
        h = jnp.maximum(h @ w_hid[l] + b_hid[l], 0.0)
    ref = jnp.maximum(h @ w_out + b_out, 0.0)

    assert out.shape == (B, OUT_DIM)
    assert jnp.allclose(out, ref, atol=1e-5, rtol=1e-5)
    print("KERNEL_OK")
</pallas_src>

<mosaic_0001>
module attributes {stable_mosaic.version = 11 : i64} {
  func.func @mlp_kernel(%arg0: i32, %arg1: memref<64x128xf32, #tpu.memory_space<vmem>>, %arg2: memref<128x256xf32, #tpu.memory_space<vmem>>, %arg3: memref<1x256xf32, #tpu.memory_space<vmem>>, %arg4: memref<4x256x256xf32, #tpu.memory_space<vmem>>, %arg5: memref<4x1x256xf32, #tpu.memory_space<vmem>>, %arg6: memref<256x128xf32, #tpu.memory_space<vmem>>, %arg7: memref<1x128xf32, #tpu.memory_space<vmem>>, %arg8: memref<64x128xf32, #tpu.memory_space<vmem>>) attributes {dimension_semantics = [#tpu.dimension_semantics<parallel>], iteration_bounds = array<i64: 1>, scalar_prefetch = 0 : i64, scratch_operands = 0 : i64, tpu.core_type = #tpu.core_type<tc>, window_params = [{transform_indices = @transform_0, window_bounds = array<i64: 64, 128>}, {pipeline_mode = #tpu.pipeline_mode<synchronous>, transform_indices = @transform_1, window_bounds = array<i64: 128, 256>}, {pipeline_mode = #tpu.pipeline_mode<synchronous>, transform_indices = @transform_2, window_bounds = array<i64: 1, 256>}, {pipeline_mode = #tpu.pipeline_mode<synchronous>, transform_indices = @transform_3, window_bounds = array<i64: 4, 256, 256>}, {pipeline_mode = #tpu.pipeline_mode<synchronous>, transform_indices = @transform_4, window_bounds = array<i64: 4, 1, 256>}, {pipeline_mode = #tpu.pipeline_mode<synchronous>, transform_indices = @transform_5, window_bounds = array<i64: 256, 128>}, {pipeline_mode = #tpu.pipeline_mode<synchronous>, transform_indices = @transform_6, window_bounds = array<i64: 1, 128>}, {transform_indices = @transform_7, window_bounds = array<i64: 64, 128>}]} {
    %c0 = arith.constant 0 : index
    %c0_0 = arith.constant 0 : index
    %0 = vector.load %arg1[%c0, %c0_0] : memref<64x128xf32, #tpu.memory_space<vmem>>, vector<64x128xf32>
    %c0_1 = arith.constant 0 : index
    %c0_2 = arith.constant 0 : index
    %1 = vector.load %arg2[%c0_1, %c0_2] : memref<128x256xf32, #tpu.memory_space<vmem>>, vector<128x256xf32>
    %cst = arith.constant dense<0.000000e+00> : vector<64x256xf32>
    %2 = tpu.matmul %0, %1, %cst {dimension_numbers = #tpu.dot_dimension_numbers<[1], [0], [0], [1], [0, 0, 1, 1], [], []>} : vector<64x128xf32>, vector<128x256xf32>, vector<64x256xf32> -> vector<64x256xf32>
    %c0_3 = arith.constant 0 : index
    %c0_4 = arith.constant 0 : index
    %3 = vector.load %arg3[%c0_3, %c0_4] : memref<1x256xf32, #tpu.memory_space<vmem>>, vector<1x256xf32>
    %4 = vector.broadcast %3 : vector<1x256xf32> to vector<64x256xf32>
    %5 = arith.addf %2, %4 : vector<64x256xf32>
    %cst_5 = arith.constant 0.000000e+00 : f32
    %6 = vector.broadcast %cst_5 : f32 to vector<64x256xf32>
    %7 = arith.maximumf %5, %6 : vector<64x256xf32>
    %c0_6 = arith.constant 0 : index
    %c0_7 = arith.constant 0 : index
    %c0_8 = arith.constant 0 : index
    %8 = vector.load %arg4[%c0_6, %c0_7, %c0_8] : memref<4x256x256xf32, #tpu.memory_space<vmem>>, vector<1x256x256xf32>
    %9 = vector.shape_cast %8 : vector<1x256x256xf32> to vector<256x256xf32>
    %cst_9 = arith.constant dense<0.000000e+00> : vector<64x256xf32>
    %10 = tpu.matmul %7, %9, %cst_9 {dimension_numbers = #tpu.dot_dimension_numbers<[1], [0], [0], [1], [0, 0, 1, 1], [], []>} : vector<64x256xf32>, vector<256x256xf32>, vector<64x256xf32> -> vector<64x256xf32>
    %c0_10 = arith.constant 0 : index
    %c0_11 = arith.constant 0 : index
    %c0_12 = arith.constant 0 : index
    %11 = vector.load %arg5[%c0_10, %c0_11, %c0_12] : memref<4x1x256xf32, #tpu.memory_space<vmem>>, vector<1x1x256xf32>
    %12 = vector.shape_cast %11 : vector<1x1x256xf32> to vector<1x256xf32>
    %13 = vector.broadcast %12 : vector<1x256xf32> to vector<64x256xf32>
    %14 = arith.addf %10, %13 : vector<64x256xf32>
    %cst_13 = arith.constant 0.000000e+00 : f32
    %15 = vector.broadcast %cst_13 : f32 to vector<64x256xf32>
    %16 = arith.maximumf %14, %15 : vector<64x256xf32>
    %c1 = arith.constant 1 : index
    %c0_14 = arith.constant 0 : index
    %c0_15 = arith.constant 0 : index
    %17 = vector.load %arg4[%c1, %c0_14, %c0_15] : memref<4x256x256xf32, #tpu.memory_space<vmem>>, vector<1x256x256xf32>
    %18 = vector.shape_cast %17 : vector<1x256x256xf32> to vector<256x256xf32>
    %cst_16 = arith.constant dense<0.000000e+00> : vector<64x256xf32>
    %19 = tpu.matmul %16, %18, %cst_16 {dimension_numbers = #tpu.dot_dimension_numbers<[1], [0], [0], [1], [0, 0, 1, 1], [], []>} : vector<64x256xf32>, vector<256x256xf32>, vector<64x256xf32> -> vector<64x256xf32>
    %c1_17 = arith.constant 1 : index
    %c0_18 = arith.constant 0 : index
    %c0_19 = arith.constant 0 : index
    %20 = vector.load %arg5[%c1_17, %c0_18, %c0_19] : memref<4x1x256xf32, #tpu.memory_space<vmem>>, vector<1x1x256xf32>
    %21 = vector.shape_cast %20 : vector<1x1x256xf32> to vector<1x256xf32>
    %22 = vector.broadcast %21 : vector<1x256xf32> to vector<64x256xf32>
    %23 = arith.addf %19, %22 : vector<64x256xf32>
    %cst_20 = arith.constant 0.000000e+00 : f32
    %24 = vector.broadcast %cst_20 : f32 to vector<64x256xf32>
    %25 = arith.maximumf %23, %24 : vector<64x256xf32>
    %c2 = arith.constant 2 : index
    %c0_21 = arith.constant 0 : index
    %c0_22 = arith.constant 0 : index
    %26 = vector.load %arg4[%c2, %c0_21, %c0_22] : memref<4x256x256xf32, #tpu.memory_space<vmem>>, vector<1x256x256xf32>
    %27 = vector.shape_cast %26 : vector<1x256x256xf32> to vector<256x256xf32>
    %cst_23 = arith.constant dense<0.000000e+00> : vector<64x256xf32>
    %28 = tpu.matmul %25, %27, %cst_23 {dimension_numbers = #tpu.dot_dimension_numbers<[1], [0], [0], [1], [0, 0, 1, 1], [], []>} : vector<64x256xf32>, vector<256x256xf32>, vector<64x256xf32> -> vector<64x256xf32>
    %c2_24 = arith.constant 2 : index
    %c0_25 = arith.constant 0 : index
    %c0_26 = arith.constant 0 : index
    %29 = vector.load %arg5[%c2_24, %c0_25, %c0_26] : memref<4x1x256xf32, #tpu.memory_space<vmem>>, vector<1x1x256xf32>
    %30 = vector.shape_cast %29 : vector<1x1x256xf32> to vector<1x256xf32>
    %31 = vector.broadcast %30 : vector<1x256xf32> to vector<64x256xf32>
    %32 = arith.addf %28, %31 : vector<64x256xf32>
    %cst_27 = arith.constant 0.000000e+00 : f32
    %33 = vector.broadcast %cst_27 : f32 to vector<64x256xf32>
    %34 = arith.maximumf %32, %33 : vector<64x256xf32>
    %c3 = arith.constant 3 : index
    %c0_28 = arith.constant 0 : index
    %c0_29 = arith.constant 0 : index
    %35 = vector.load %arg4[%c3, %c0_28, %c0_29] : memref<4x256x256xf32, #tpu.memory_space<vmem>>, vector<1x256x256xf32>
    %36 = vector.shape_cast %35 : vector<1x256x256xf32> to vector<256x256xf32>
    %cst_30 = arith.constant dense<0.000000e+00> : vector<64x256xf32>
    %37 = tpu.matmul %34, %36, %cst_30 {dimension_numbers = #tpu.dot_dimension_numbers<[1], [0], [0], [1], [0, 0, 1, 1], [], []>} : vector<64x256xf32>, vector<256x256xf32>, vector<64x256xf32> -> vector<64x256xf32>
    %c3_31 = arith.constant 3 : index
    %c0_32 = arith.constant 0 : index
    %c0_33 = arith.constant 0 : index
    %38 = vector.load %arg5[%c3_31, %c0_32, %c0_33] : memref<4x1x256xf32, #tpu.memory_space<vmem>>, vector<1x1x256xf32>
    %39 = vector.shape_cast %38 : vector<1x1x256xf32> to vector<1x256xf32>
    %40 = vector.broadcast %39 : vector<1x256xf32> to vector<64x256xf32>
    %41 = arith.addf %37, %40 : vector<64x256xf32>
    %cst_34 = arith.constant 0.000000e+00 : f32
    %42 = vector.broadcast %cst_34 : f32 to vector<64x256xf32>
    %43 = arith.maximumf %41, %42 : vector<64x256xf32>
    %c0_35 = arith.constant 0 : index
    %c0_36 = arith.constant 0 : index
    %44 = vector.load %arg6[%c0_35, %c0_36] : memref<256x128xf32, #tpu.memory_space<vmem>>, vector<256x128xf32>
    %cst_37 = arith.constant dense<0.000000e+00> : vector<64x128xf32>
    %45 = tpu.matmul %43, %44, %cst_37 {dimension_numbers = #tpu.dot_dimension_numbers<[1], [0], [0], [1], [0, 0, 1, 1], [], []>} : vector<64x256xf32>, vector<256x128xf32>, vector<64x128xf32> -> vector<64x128xf32>
    %c0_38 = arith.constant 0 : index
    %c0_39 = arith.constant 0 : index
    %46 = vector.load %arg7[%c0_38, %c0_39] : memref<1x128xf32, #tpu.memory_space<vmem>>, vector<1x128xf32>
    %47 = vector.broadcast %46 : vector<1x128xf32> to vector<64x128xf32>
    %48 = arith.addf %45, %47 : vector<64x128xf32>
    %cst_40 = arith.constant 0.000000e+00 : f32
    %49 = vector.broadcast %cst_40 : f32 to vector<64x128xf32>
    %50 = arith.maximumf %48, %49 : vector<64x128xf32>
    %c0_41 = arith.constant 0 : index
    %c0_42 = arith.constant 0 : index
    %51 = vector.load %arg8[%c0_41, %c0_42] : memref<64x128xf32, #tpu.memory_space<vmem>>, vector<64x128xf32>
    tpu.vector_store %arg8[%c0_41, %c0_42], %50 {strides = array<i32>} : memref<64x128xf32, #tpu.memory_space<vmem>>, vector<64x128xf32>,
    return
  }
  func.func @transform_0(%arg0: i32) -> (i32, i32) {
    %c0_i32 = arith.constant 0 : i32
    %c0_i32_0 = arith.constant 0 : i32
    return %arg0, %c0_i32 : i32, i32
  }
  func.func @transform_1(%arg0: i32) -> (i32, i32) {
    %c0_i32 = arith.constant 0 : i32
    %c0_i32_0 = arith.constant 0 : i32
    %c0_i32_1 = arith.constant 0 : i32
    return %c0_i32, %c0_i32_0 : i32, i32
  }
  func.func @transform_2(%arg0: i32) -> (i32, i32) {
    %c0_i32 = arith.constant 0 : i32
    %c0_i32_0 = arith.constant 0 : i32
    %c0_i32_1 = arith.constant 0 : i32
    return %c0_i32, %c0_i32_0 : i32, i32
  }
  func.func @transform_3(%arg0: i32) -> (i32, i32, i32) {
    %c0_i32 = arith.constant 0 : i32
    %c0_i32_0 = arith.constant 0 : i32
    %c0_i32_1 = arith.constant 0 : i32
    %c0_i32_2 = arith.constant 0 : i32
    return %c0_i32, %c0_i32_0, %c0_i32_1 : i32, i32, i32
  }
  func.func @transform_4(%arg0: i32) -> (i32, i32, i32) {
    %c0_i32 = arith.constant 0 : i32
    %c0_i32_0 = arith.constant 0 : i32
    %c0_i32_1 = arith.constant 0 : i32
    %c0_i32_2 = arith.constant 0 : i32
    return %c0_i32, %c0_i32_0, %c0_i32_1 : i32, i32, i32
  }
  func.func @transform_5(%arg0: i32) -> (i32, i32) {
    %c0_i32 = arith.constant 0 : i32
    %c0_i32_0 = arith.constant 0 : i32
    %c0_i32_1 = arith.constant 0 : i32
    return %c0_i32, %c0_i32_0 : i32, i32
  }
  func.func @transform_6(%arg0: i32) -> (i32, i32) {
    %c0_i32 = arith.constant 0 : i32
    %c0_i32_0 = arith.constant 0 : i32
    %c0_i32_1 = arith.constant 0 : i32
    return %c0_i32, %c0_i32_0 : i32, i32
  }
  func.func @transform_7(%arg0: i32) -> (i32, i32) {
    %c0_i32 = arith.constant 0 : i32
    %c0_i32_0 = arith.constant 0 : i32
    return %arg0, %c0_i32 : i32, i32
  }
}

</mosaic_0001>

<bundles_post_ra>
// kernel: simple_net_forward.1
= control target key start
LH: loop header
LB: loop body
LE: loop exit
PB: predicated region body
PF: predicated region fallthrough
CT: control target
= control target key end

     0   :  { %12 = vsyncpa [#allocation3], 0  ;;  %s1620_s24 = smov [#allocation2]   ;;  %s1956_s0 = inlined_call_operand.vmem [shape: f32[64,128], index: 0, kind: input, shape index: {}]   ;;  %s1957_s1 = inlined_call_operand.vmem [shape: f32[128,256], index: 1, kind: input, shape index: {}]   ;;  %s1958_s2 = inlined_call_operand.vmem [shape: f32[1,256], index: 2, kind: input, shape index: {}]   ;;  %s1959_s3 = inlined_call_operand.hbm [shape: f32[4,256,256], index: 3, kind: input, shape index: {}]   ;;  %s1960_s4 = inlined_call_operand.vmem [shape: f32[4,1,256], index: 4, kind: input, shape index: {}]   ;;  %s1961_s5 = inlined_call_operand.vmem [shape: f32[256,128], index: 5, kind: input, shape index: {}]   ;;  %s1962_s6 = inlined_call_operand.vmem [shape: f32[1,128], index: 6, kind: input, shape index: {}]   ;;  %s1963_s7 = inlined_call_operand.vmem [shape: f32[64,128], index: 7, kind: output, shape index: {}]  }
   0x1   :  { %s24_s25 = sshll.u32 %s1620_s24, 4  ;;  %s1596_s28 = scalar_lea.hbm %s1959_s3, 32768  ;;  %s25_s25 = int_to_ptr.vmem [resolvable:$true] %s24_s25 }
   0x2   :  { %p1597_p0 = scmp.ne.s32.totalorder %s1959_s3, %s1596_s28  ;;  %p1600_p1 = scmp.lt.u32.totalorder %s1596_s28, %s1959_s3 }
   0x4   :  { %p1602_p2 = pnand %p1600_p1, %p1597_p0 }
   0x6   :  { %1605 = shalt.err (!%p1602_p2)
}
   0x7   :  { %s1606_s10 = scalar_lea.vmem %s25_s25, 32768  ;;  %p1611_p4 = scmp.lt.s32.totalorder %s25_s25, %s25_s25 }
   0x8   :  { %p1607_p3 = scmp.ne.s32.totalorder %s25_s25, %s1606_s10  ;;  %p1612_p5 = scmp.lt.s32.totalorder %s1606_s10, %s1606_s10 }
   0xa   :  { %p1613_p6 = por %p1612_p5, %p1611_p4 }
   0xc   :  { %p1614_p7 = pnand %p1613_p6, %p1607_p3 }
   0xe   :  { %1617 = shalt.err (!%p1614_p7)
}
   0xf   :  { %s1621_s11 = smov 256   ;;  %s1622_s12 = smov 16  }
  0x10   :  { %30 = dma.hbm_to_vmem [thread:$0]  %s1959_s3, 32768, %s25_s25, [#allocation3], %s1621_s11, %s1621_s11, %s1622_s12  }
  0x11   :  { %1618 = dma.done.wait [#allocation3], 32768  }
  0x12   :  { %1619 = vsyncadd [#allocation3], 4294934528  ;;  %v1623_v0 = vmov 0.0   ;;  %v49_v1 = vld [vmem:[%s1957_s1 + $0x8] sm:$0xff]  ;;  %v51_v2 = vld [vmem:[%s1957_s1 + $0x18] sm:$0xff] }
  0x13   :  { %156 = vmatprep.mubr.f32.mxu0 %v1623_v0  ;;  %v48_v3 = vld [vmem:[%s1957_s1] sm:$0xff]  ;;  %v1272_v4 = vpack.c.bf16 %v51_v2, %v49_v1  ;;  %v50_v5 = vld [vmem:[%s1957_s1 + $0x10] sm:$0xff]  ;;  %v53_v6 = vld [vmem:[%s1957_s1 + $0x28] sm:$0xff] }
  0x14   :  { %v55_v7 = vld [vmem:[%s1957_s1 + $0x38] sm:$0xff]  ;;  %v1274_v8 = vpack.c.bf16 %v50_v5, %v48_v3  ;;  %v52_v10 = vld [vmem:[%s1957_s1 + $0x20] sm:$0xff]  ;;  %v54_v11 = vld [vmem:[%s1957_s1 + $0x30] sm:$0xff] }
  0x15   :  { %v1276_v9 = vpack.c.bf16 %v55_v7, %v53_v6  ;;  %v57_v12 = vld [vmem:[%s1957_s1 + $0x48] sm:$0xff]  ;;  %1273 = vmatprep.subr.bf16.mxu0 %v1272_v4  ;;  %v59_v13 = vld [vmem:[%s1957_s1 + $0x58] sm:$0xff]  ;;  %v1278_v14 = vpack.c.bf16 %v54_v11, %v52_v10  ;;  %v56_v16 = vld [vmem:[%s1957_s1 + $0x40] sm:$0xff] }
  0x16   :  { %1275 = vmatpush1.bf16.msra.mxu0 %v1274_v8  ;;  %v1280_v15 = vpack.c.bf16 %v59_v13, %v57_v12  ;;  %v58_v17 = vld [vmem:[%s1957_s1 + $0x50] sm:$0xff]  ;;  %v61_v18 = vld [vmem:[%s1957_s1 + $0x68] sm:$0xff]  ;;  %v63_v19 = vld [vmem:[%s1957_s1 + $0x78] sm:$0xff] }
  0x17   :  { %1277 = vmatprep.subr.bf16.mxu0 %v1276_v9  ;;  %v1282_v20 = vpack.c.bf16 %v58_v17, %v56_v16  ;;  %v1284_v21 = vpack.c.bf16 %v63_v19, %v61_v18  ;;  %v60_v22 = vld [vmem:[%s1957_s1 + $0x60] sm:$0xff]  ;;  %v62_v23 = vld [vmem:[%s1957_s1 + $0x70] sm:$0xff]  ;;  %v65_v24 = vld [vmem:[%s1957_s1 + $0x88] sm:$0xff] }
  0x18   :  { %v67_v25 = vld [vmem:[%s1957_s1 + $0x98] sm:$0xff]  ;;  %v1286_v26 = vpack.c.bf16 %v62_v23, %v60_v22  ;;  %v64_v27 = vld [vmem:[%s1957_s1 + $0x80] sm:$0xff]  ;;  %v66_v28 = vld [vmem:[%s1957_s1 + $0x90] sm:$0xff] }
  0x19   :  { %v69_v29 = vld [vmem:[%s1957_s1 + $0xa8] sm:$0xff]  ;;  %v1288_v30 = vpack.c.bf16 %v67_v25, %v65_v24  ;;  %v71_v31 = vld [vmem:[%s1957_s1 + $0xb8] sm:$0xff]  ;;  %v221_v35 = vld [vmem:[#allocation2] sm:$0xff]  ;;  %v1290_v42 = vpack.c.bf16 %v66_v28, %v64_v27 }
  0x1a   :  { %1279 = vmatpush1.bf16.msra.mxu0 %v1278_v14  ;;  %v222_v32 = vld [vmem:[#allocation2 + $0x8] sm:$0xff]  ;;  %v224_v33 = vld [vmem:[#allocation2 + $0x18] sm:$0xff]  ;;  %v223_v36 = vld [vmem:[#allocation2 + $0x10] sm:$0xff]  ;;  %v1292_v46 = vpack.c.bf16 %v71_v31, %v69_v29 }
  0x1b   :  { %1281 = vmatprep.subr.bf16.mxu0 %v1280_v15  ;;  %v1304_v34 = vpack.c.bf16 %v224_v33, %v222_v32  ;;  %v226_v37 = vld [vmem:[#allocation2 + $0x28] sm:$0xff]  ;;  %v1306_v38 = vpack.c.bf16 %v223_v36, %v221_v35  ;;  %v228_v39 = vld [vmem:[#allocation2 + $0x38] sm:$0xff]  ;;  %v225_v40 = vld [vmem:[#allocation2 + $0x20] sm:$0xff] }
  0x1c   :  { %v227_v41 = vld [vmem:[#allocation2 + $0x30] sm:$0xff]  ;;  %v1308_v43 = vpack.c.bf16 %v228_v39, %v226_v37  ;;  %v230_v44 = vld [vmem:[#allocation2 + $0x48] sm:$0xff]  ;;  %v232_v45 = vld [vmem:[#allocation2 + $0x58] sm:$0xff] }
  0x1d   :  { %1305 = vmatprep.subr.bf16.mxu1 %v1304_v34  ;;  %v68_v47 = vld [vmem:[%s1957_s1 + $0xa0] sm:$0xff]  ;;  %v70_v48 = vld [vmem:[%s1957_s1 + $0xb0] sm:$0xff]  ;;  %v73_v49 = vld [vmem:[%s1957_s1 + $0xc8] sm:$0xff]  ;;  %v1310_v50 = vpack.c.bf16 %v227_v41, %v225_v40  ;;  %v1312_v52 = vpack.c.bf16 %v232_v45, %v230_v44 }
  0x1e   :  { %1283 = vmatpush1.bf16.msra.mxu0 %v1282_v20  ;;  %1307 = vmatpush1.bf16.msra.mxu1 %v1306_v38  ;;  %v75_v51 = vld [vmem:[%s1957_s1 + $0xd8] sm:$0xff]  ;;  %v229_v53 = vld [vmem:[#allocation2 + $0x40] sm:$0xff]  ;;  %v231_v54 = vld [vmem:[#allocation2 + $0x50] sm:$0xff]  ;;  %v1294_v57 = vpack.c.bf16 %v70_v48, %v68_v47 }
  0x1f   :  { %1285 = vmatprep.subr.bf16.mxu0 %v1284_v21  ;;  %1309 = vmatprep.subr.bf16.mxu1 %v1308_v43  ;;  %v234_v55 = vld [vmem:[#allocation2 + $0x68] sm:$0xff]  ;;  %v236_v56 = vld [vmem:[#allocation2 + $0x78] sm:$0xff]  ;;  %v1296_v58 = vpack.c.bf16 %v75_v51, %v73_v49  ;;  %v72_v59 = vld [vmem:[%s1957_s1 + $0xc0] sm:$0xff]  ;;  %v1314_v62 = vpack.c.bf16 %v231_v54, %v229_v53 }
  0x20   :  { %v74_v60 = vld [vmem:[%s1957_s1 + $0xd0] sm:$0xff]  ;;  %v77_v61 = vld [vmem:[%s1957_s1 + $0xe8] sm:$0xff]  ;;  %v79_v63 = vld [vmem:[%s1957_s1 + $0xf8] sm:$0xff]  ;;  %v1316_v1 = vpack.c.bf16 %v236_v56, %v234_v55 }
  0x21   :  { %v233_v2 = vld [vmem:[#allocation2 + $0x60] sm:$0xff]  ;;  %v235_v3 = vld [vmem:[#allocation2 + $0x70] sm:$0xff]  ;;  %v238_v4 = vld [vmem:[#allocation2 + $0x88] sm:$0xff]  ;;  %v1298_v6 = vpack.c.bf16 %v74_v60, %v72_v59  ;;  %v1300_v7 = vpack.c.bf16 %v79_v63, %v77_v61 }
  0x22   :  { %1287 = vmatpush1.bf16.msra.mxu0 %v1286_v26  ;;  %1311 = vmatpush1.bf16.msra.mxu1 %v1310_v50  ;;  %v240_v5 = vld [vmem:[#allocation2 + $0x98] sm:$0xff]  ;;  %v76_v8 = vld [vmem:[%s1957_s1 + $0xe0] sm:$0xff]  ;;  %v78_v9 = vld [vmem:[%s1957_s1 + $0xf0] sm:$0xff]  ;;  %v1318_v10 = vpack.c.bf16 %v235_v3, %v233_v2 }
  0x23   :  { %1289 = vmatprep.subr.bf16.mxu0 %v1288_v30  ;;  %1313 = vmatprep.subr.bf16.mxu1 %v1312_v52  ;;  %v1320_v11 = vpack.c.bf16 %v240_v5, %v238_v4  ;;  %v237_v12 = vld [vmem:[#allocation2 + $0x80] sm:$0xff]  ;;  %v239_v13 = vld [vmem:[#allocation2 + $0x90] sm:$0xff]  ;;  %v242_v14 = vld [vmem:[#allocation2 + $0xa8] sm:$0xff]  ;;  %v1302_v16 = vpack.c.bf16 %v78_v9, %v76_v8 }
  0x24   :  { %v244_v15 = vld [vmem:[#allocation2 + $0xb8] sm:$0xff]  ;;  %v1322_v17 = vpack.c.bf16 %v239_v13, %v237_v12  ;;  %v241_v19 = vld [vmem:[#allocation2 + $0xa0] sm:$0xff]  ;;  %v243_v20 = vld [vmem:[#allocation2 + $0xb0] sm:$0xff] }
  0x25   :  { %v1324_v18 = vpack.c.bf16 %v244_v15, %v242_v14  ;;  %v246_v21 = vld [vmem:[#allocation2 + $0xc8] sm:$0xff]  ;;  %v248_v22 = vld [vmem:[#allocation2 + $0xd8] sm:$0xff]  ;;  %v40_v23 = vld [vmem:[%s1956_s0] sm:$0xff]  ;;  %v1326_v24 = vpack.c.bf16 %v243_v20, %v241_v19 }
  0x26   :  { %1291 = vmatpush1.bf16.msra.mxu0 %v1290_v42  ;;  %1315 = vmatpush1.bf16.msra.mxu1 %v1314_v62  ;;  %v1328_v25 = vpack.c.bf16 %v248_v22, %v246_v21  ;;  %v245_v26 = vld [vmem:[#allocation2 + $0xc0] sm:$0xff]  ;;  %v247_v27 = vld [vmem:[#allocation2 + $0xd0] sm:$0xff]  ;;  %v250_v28 = vld [vmem:[#allocation2 + $0xe8] sm:$0xff] }
  0x27   :  { %1293 = vmatprep.subr.bf16.mxu0 %v1292_v46  ;;  %1317 = vmatprep.subr.bf16.mxu1 %v1316_v1  ;;  %v252_v29 = vld [vmem:[#allocation2 + $0xf8] sm:$0xff]  ;;  %v41_v30 = vld [vmem:[%s1956_s0 + $0x8] sm:$0xff]  ;;  %v1330_v31 = vpack.c.bf16 %v247_v27, %v245_v26  ;;  %v249_v33 = vld [vmem:[#allocation2 + $0xe0] sm:$0xff] }
  0x28   :  { %v1332_v32 = vpack.c.bf16 %v252_v29, %v250_v28  ;;  %v251_v34 = vld [vmem:[#allocation2 + $0xf0] sm:$0xff]  ;;  %v254_v35 = vld [vmem:[#allocation2 + $0x108] sm:$0xff]  ;;  %v256_v36 = vld [vmem:[#allocation2 + $0x118] sm:$0xff] }
  0x29   :  { %v42_v37 = vld [vmem:[%s1956_s0 + $0x10] sm:$0xff]  ;;  %v1334_v38 = vpack.c.bf16 %v251_v34, %v249_v33  ;;  %v1336_v39 = vpack.c.bf16 %v256_v36, %v254_v35  ;;  %v253_v40 = vld [vmem:[#allocation2 + $0x100] sm:$0xff]  ;;  %v258_v42 = vld [vmem:[#allocation2 + $0x128] sm:$0xff] }
  0x2a   :  { %1295 = vmatpush1.bf16.msra.mxu0 %v1294_v57  ;;  %1319 = vmatpush1.bf16.msra.mxu1 %v1318_v10  ;;  %v255_v41 = vld [vmem:[#allocation2 + $0x110] sm:$0xff]  ;;  %v260_v43 = vld [vmem:[#allocation2 + $0x138] sm:$0xff]  ;;  %v257_v47 = vld [vmem:[#allocation2 + $0x120] sm:$0xff] }
  0x2b   :  { %1297 = vmatprep.subr.bf16.mxu0 %v1296_v58  ;;  %1321 = vmatprep.subr.bf16.mxu1 %v1320_v11  ;;  %v43_v44 = vld [vmem:[%s1956_s0 + $0x18] sm:$0xff]  ;;  %v1338_v45 = vpack.c.bf16 %v255_v41, %v253_v40  ;;  %v1340_v46 = vpack.c.bf16 %v260_v43, %v258_v42  ;;  %v259_v48 = vld [vmem:[#allocation2 + $0x130] sm:$0xff]  ;;  %v262_v49 = vld [vmem:[#allocation2 + $0x148] sm:$0xff] }
  0x2c   :  { %v264_v50 = vld [vmem:[#allocation2 + $0x158] sm:$0xff]  ;;  %v44_v51 = vld [vmem:[%s1956_s0 + $0x20] sm:$0xff]  ;;  %v1342_v52 = vpack.c.bf16 %v259_v48, %v257_v47  ;;  %v263_v55 = vld [vmem:[#allocation2 + $0x150] sm:$0xff] }
  0x2d   :  { %v1344_v53 = vpack.c.bf16 %v264_v50, %v262_v49  ;;  %v261_v54 = vld [vmem:[#allocation2 + $0x140] sm:$0xff]  ;;  %v266_v56 = vld [vmem:[#allocation2 + $0x168] sm:$0xff]  ;;  %v268_v57 = vld [vmem:[#allocation2 + $0x178] sm:$0xff] }
  0x2e   :  { %1299 = vmatpush1.bf16.msra.mxu0 %v1298_v6  ;;  %1323 = vmatpush1.bf16.msra.mxu1 %v1322_v17  ;;  %v45_v58 = vld [vmem:[%s1956_s0 + $0x28] sm:$0xff]  ;;  %v1346_v59 = vpack.c.bf16 %v263_v55, %v261_v54  ;;  %v1348_v60 = vpack.c.bf16 %v268_v57, %v266_v56  ;;  %v265_v61 = vld [vmem:[#allocation2 + $0x160] sm:$0xff]  ;;  %v267_v62 = vld [vmem:[#allocation2 + $0x170] sm:$0xff] }
  0x2f   :  { %1301 = vmatprep.subr.bf16.mxu0 %v1300_v7  ;;  %1325 = vmatprep.subr.bf16.mxu1 %v1324_v18  ;;  %v270_v63 = vld [vmem:[#allocation2 + $0x188] sm:$0xff]  ;;  %v272_v1 = vld [vmem:[#allocation2 + $0x198] sm:$0xff]  ;;  %v46_v2 = vld [vmem:[%s1956_s0 + $0x30] sm:$0xff]  ;;  %v1350_v3 = vpack.c.bf16 %v267_v62, %v265_v61 }
  0x30   :  { %v1352_v4 = vpack.c.bf16 %v272_v1, %v270_v63  ;;  %v269_v5 = vld [vmem:[#allocation2 + $0x180] sm:$0xff]  ;;  %v271_v6 = vld [vmem:[#allocation2 + $0x190] sm:$0xff]  ;;  %v274_v7 = vld [vmem:[#allocation2 + $0x1a8] sm:$0xff] }
  0x31   :  { %v276_v8 = vld [vmem:[#allocation2 + $0x1b8] sm:$0xff]  ;;  %v1354_v10 = vpack.c.bf16 %v271_v6, %v269_v5  ;;  %v273_v12 = vld [vmem:[#allocation2 + $0x1a0] sm:$0xff]  ;;  %v275_v13 = vld [vmem:[#allocation2 + $0x1b0] sm:$0xff] }
  0x32   :  { %1303 = vmatpush1.bf16.msra.mxu0 %v1302_v16  ;;  %1327 = vmatpush1.bf16.msra.mxu1 %v1326_v24  ;;  %v47_v9 = vld [vmem:[%s1956_s0 + $0x38] sm:$0xff]  ;;  %v1356_v11 = vpack.c.bf16 %v276_v8, %v274_v7  ;;  %v278_v14 = vld [vmem:[#allocation2 + $0x1c8] sm:$0xff]  ;;  %v1358_v16 = vpack.c.bf16 %v275_v13, %v273_v12  ;;  %v279_v18 = vld [vmem:[#allocation2 + $0x1d0] sm:$0xff] }
  0x33   :  { %1329 = vmatprep.subr.bf16.mxu1 %v1328_v25  ;;  %v280_v15 = vld [vmem:[#allocation2 + $0x1d8] sm:$0xff]  ;;  %v282_v20 = vld [vmem:[#allocation2 + $0x1e8] sm:$0xff]  ;;  %v283_v24 = vld [vmem:[#allocation2 + $0x1f0] sm:$0xff] }
  0x34   :  { %v1360_v17 = vpack.c.bf16 %v280_v15, %v278_v14  ;;  %v284_v21 = vld [vmem:[#allocation2 + $0x1f8] sm:$0xff]  ;;  %v428_v26 = vld [vmem:[#allocation2 + $0x208] sm:$0xff]  ;;  %v427_v28 = vld [vmem:[#allocation2 + $0x200] sm:$0xff] }
  0x35   :  { %157 = vmatmul.mubr.f32.vlgmr.msra.gmra.mrb[0].mxu0 %v40_v23  ;;  %v1364_v22 = vpack.c.bf16 %v284_v21, %v282_v20  ;;  %v281_v23 = vld [vmem:[#allocation2 + $0x1e0] sm:$0xff]  ;;  %v430_v27 = vld [vmem:[#allocation2 + $0x218] sm:$0xff]  ;;  %v433_v36 = vld [vmem:[#allocation2 + $0x230] sm:$0xff] }
  0x36   :  { %162 = vmatprep.mubr.f32.mxu0 %v1623_v0  ;;  %1331 = vmatpush1.bf16.msra.mxu1 %v1330_v31  ;;  %v1366_v25 = vpack.c.bf16 %v283_v24, %v281_v23  ;;  %v1368_v29 = vpack.c.bf16 %v430_v27, %v428_v26  ;;  %v432_v31 = vld [vmem:[#allocation2 + $0x228] sm:$0xff]  ;;  %v431_v35 = vld [vmem:[#allocation2 + $0x220] sm:$0xff]  ;;  %v437_v42 = vld [vmem:[#allocation2 + $0x250] sm:$0xff] }
  0x37   :  { %1333 = vmatprep.subr.bf16.mxu1 %v1332_v32  ;;  %v434_v32 = vld [vmem:[#allocation2 + $0x238] sm:$0xff]  ;;  %v435_v41 = vld [vmem:[#allocation2 + $0x240] sm:$0xff]  ;;  %v440_v43 = vld [vmem:[#allocation2 + $0x268] sm:$0xff] }
  0x38   :  { %v1372_v34 = vpack.c.bf16 %v434_v32, %v432_v31  ;;  %1369 = vmatprep.subr.bf16.mxu0 %v1368_v29  ;;  %v439_v47 = vld [vmem:[#allocation2 + $0x260] sm:$0xff]  ;;  %v441_v48 = vld [vmem:[#allocation2 + $0x270] sm:$0xff]  ;;  %v444_v49 = vld [vmem:[#allocation2 + $0x288] sm:$0xff] }
  0x39   :  { %163 = vmatmul.mubr.f32.gmra.mrb[2].mxu0 %v41_v30  ;;  %v429_v30 = vld [vmem:[#allocation2 + $0x210] sm:$0xff]  ;;  %v446_v50 = vld [vmem:[#allocation2 + $0x298] sm:$0xff]  ;;  %v448_v55 = vld [vmem:[#allocation2 + $0x2a8] sm:$0xff] }
  0x3a   :  { %168 = vmatprep.mubr.f32.mxu0 %v1623_v0  ;;  %1335 = vmatpush1.bf16.msra.mxu1 %v1334_v38  ;;  %v1370_v33 = vpack.c.bf16 %v429_v30, %v427_v28  ;;  %v438_v38 = vld [vmem:[#allocation2 + $0x258] sm:$0xff]  ;;  %v445_v54 = vld [vmem:[#allocation2 + $0x290] sm:$0xff]  ;;  %v452_v61 = vld [vmem:[#allocation2 + $0x2c8] sm:$0xff] }
  0x3b   :  { %1337 = vmatprep.subr.bf16.mxu1 %v1336_v39  ;;  %v1374_v39 = vpack.c.bf16 %v433_v36, %v431_v35  ;;  %v450_v56 = vld [vmem:[#allocation2 + $0x2b8] sm:$0xff]  ;;  %v455_v8 = vld [vmem:[#allocation2 + $0x2e0] sm:$0xff]  ;;  %v461_v15 = vld [vmem:[#allocation2 + $0x310] sm:$0xff] }
  0x3c   :  { %1371 = vmatpush1.bf16.msra.mxu0 %v1370_v33  ;;  %v454_v62 = vld [vmem:[#allocation2 + $0x2d8] sm:$0xff]  ;;  %v459_v14 = vld [vmem:[#allocation2 + $0x300] sm:$0xff]  ;;  %v465_v20 = vld [vmem:[#allocation2 + $0x330] sm:$0xff] }
  0x3d   :  { %169 = vmatmul.mubr.f32.gmra.mrb[4].mxu0 %v42_v37  ;;  %v436_v37 = vld [vmem:[#allocation2 + $0x248] sm:$0xff]  ;;  %1373 = vmatprep.subr.bf16.mxu0 %v1372_v34  ;;  %v1392_v1 = vpack.c.bf16 %v454_v62, %v452_v61  ;;  %v458_v5 = vld [vmem:[#allocation2 + $0x2f8] sm:$0xff]  ;;  %v469_v26 = vld [vmem:[#allocation2 + $0x350] sm:$0xff] }
  0x3e   :  { %174 = vmatprep.mubr.f32.mxu0 %v1623_v0  ;;  %1339 = vmatpush1.bf16.msra.mxu1 %v1338_v45  ;;  %v1376_v40 = vpack.c.bf16 %v438_v38, %v436_v37  ;;  %v1378_v45 = vpack.c.bf16 %v437_v42, %v435_v41  ;;  %v468_v21 = vld [vmem:[#allocation2 + $0x348] sm:$0xff]  ;;  %v474_v28 = vld [vmem:[#allocation2 + $0x378] sm:$0xff]  ;;  %v471_v31 = vld [vmem:[#allocation2 + $0x360] sm:$0xff] }
  0x3f   :  { %1341 = vmatprep.subr.bf16.mxu1 %v1340_v46  ;;  %v472_v27 = vld [vmem:[#allocation2 + $0x368] sm:$0xff]  ;;  %v473_v32 = vld [vmem:[#allocation2 + $0x370] sm:$0xff]  ;;  %v478_v34 = vld [vmem:[#allocation2 + $0x398] sm:$0xff] }
  0x40   :  { %1375 = vmatpush1.bf16.msra.mxu0 %v1374_v39  ;;  %v1412_v30 = vpack.c.bf16 %v474_v28, %v472_v27  ;;  %v476_v33 = vld [vmem:[#allocation2 + $0x388] sm:$0xff]  ;;  %v1414_v35 = vpack.c.bf16 %v473_v32, %v471_v31  ;;  %v475_v37 = vld [vmem:[#allocation2 + $0x380] sm:$0xff]  ;;  %v477_v38 = vld [vmem:[#allocation2 + $0x390] sm:$0xff] }
  0x41   :  { %175 = vmatmul.mubr.f32.gmra.mrb[6].mxu0 %v43_v44  ;;  %v442_v44 = vld [vmem:[#allocation2 + $0x278] sm:$0xff]  ;;  %1377 = vmatprep.subr.bf16.mxu0 %v1376_v40  ;;  %v1416_v36 = vpack.c.bf16 %v478_v34, %v476_v33  ;;  %v480_v39 = vld [vmem:[#allocation2 + $0x3a8] sm:$0xff]  ;;  %v1418_v41 = vpack.c.bf16 %v477_v38, %v475_v37 }
  0x42   :  { %180 = vmatprep.mubr.f32.mxu0 %v1623_v0  ;;  %1343 = vmatpush1.bf16.msra.mxu1 %v1342_v52  ;;  %v1380_v46 = vpack.c.bf16 %v442_v44, %v440_v43  ;;  %v1384_v52 = vpack.c.bf16 %v446_v50, %v444_v49  ;;  %v482_v40 = vld [vmem:[#allocation2 + $0x3b8] sm:$0xff]  ;;  %v479_v43 = vld [vmem:[#allocation2 + $0x3a0] sm:$0xff]  ;;  %v481_v44 = vld [vmem:[#allocation2 + $0x3b0] sm:$0xff]  ;;  %v82_v49 = vlaneseq }
  0x43   :  { %1345 = vmatprep.subr.bf16.mxu1 %v1344_v53  ;;  %v443_v53 = vld [vmem:[#allocation2 + $0x280] sm:$0xff]  ;;  %v1420_v42 = vpack.c.bf16 %v482_v40, %v480_v39 }
  0x44   :  { %1379 = vmatpush1.bf16.msra.mxu0 %v1378_v45  ;;  %v1386_v57 = vpack.c.bf16 %v445_v54, %v443_v53  ;;  %v484_v45 = vld [vmem:[#allocation2 + $0x3c8] sm:$0xff]  ;;  %v83_v50 = vshrl.u32 %v82_v49, 7  ;;  %v483_v40 = vld [vmem:[#allocation2 + $0x3c0] sm:$0xff] }
  0x45   :  { %181 = vmatmul.mubr.f32.gmra.mrb[8].mxu0 %v44_v51  ;;  %v1382_v51 = vpack.c.bf16 %v441_v48, %v439_v47  ;;  %1381 = vmatprep.subr.bf16.mxu0 %v1380_v46  ;;  %v486_v46 = vld [vmem:[#allocation2 + $0x3d8] sm:$0xff]  ;;  %v1422_v47 = vpack.c.bf16 %v481_v44, %v479_v43  ;;  %v488_v43 = vld [vmem:[#allocation2 + $0x3e8] sm:$0xff] }
  0x46   :  { %186 = vmatprep.mubr.f32.mxu0 %v1623_v0  ;;  %1347 = vmatpush1.bf16.msra.mxu1 %v1346_v59  ;;  %v447_v59 = vld [vmem:[#allocation2 + $0x2a0] sm:$0xff]  ;;  %v1424_v48 = vpack.c.bf16 %v486_v46, %v484_v45  ;;  %v1809_v53 = vsub.s32 1, %v83_v50  ;;  %v490_v44 = vld [vmem:[#allocation2 + $0x3f8] sm:$0xff]  ;;  %v635_v49 = vld [vmem:[#allocation2 + $0x408] sm:$0xff] }
  0x47   :  { %1349 = vmatprep.subr.bf16.mxu1 %v1348_v60  ;;  %v449_v60 = vld [vmem:[#allocation2 + $0x2b0] sm:$0xff]  ;;  %v1428_v45 = vpack.c.bf16 %v490_v44, %v488_v43  ;;  %v487_v46 = vld [vmem:[#allocation2 + $0x3e0] sm:$0xff] }
  0x48   :  { %1383 = vmatpush1.bf16.msra.mxu0 %v1382_v51  ;;  %v1390_v63 = vpack.c.bf16 %v449_v60, %v447_v59  ;;  %v1804_v51 = vsub.s32 0, %v83_v50  ;;  %v637_v50 = vld [vmem:[#allocation2 + $0x418] sm:$0xff]  ;;  %v670_v44 = vld [vmem:[#allocation2 + $0x520] sm:$0xff] }
  0x49   :  { %187 = vmatmul.mubr.f32.gmra.mrb[10].mxu0 %v45_v58  ;;  %1385 = vmatprep.subr.bf16.mxu0 %v1384_v52  ;;  %v1388_v58 = vpack.c.bf16 %v450_v56, %v448_v55  ;;  %v80_v52 = vld [vmem:[%s1958_s2] sm:$0x3] }
  0x4a   :  { %192 = vmatprep.mubr.f32.mxu0 %v1623_v0  ;;  %1351 = vmatpush1.bf16.msra.mxu1 %v1350_v3  ;;  %v453_v3 = vld [vmem:[#allocation2 + $0x2d0] sm:$0xff]  ;;  %v85_v54 = vrot.slane %v80_v52, %v1804_v51  ;;  %v89_v55 = vrot.slane %v80_v52, %v1809_v53  ;;  %v634_v52 = vld [vmem:[#allocation2 + $0x400] sm:$0xff] }
  0x4b   :  { %1353 = vmatprep.subr.bf16.mxu1 %v1352_v4  ;;  %v456_v4 = vld [vmem:[#allocation2 + $0x2e8] sm:$0xff] }
  0x4c   :  { %1387 = vmatpush1.bf16.msra.mxu0 %v1386_v57  ;;  %v1396_v7 = vpack.c.bf16 %v458_v5, %v456_v4 }
  0x4d   :  { %193 = vmatmul.mubr.f32.gmra.mrb[12].mxu0 %v46_v2  ;;  %1389 = vmatprep.subr.bf16.mxu0 %v1388_v58  ;;  %v451_v2 = vld [vmem:[#allocation2 + $0x2c0] sm:$0xff] }
  0x4e   :  { %198 = vmatprep.mubr.f32.mxu0 %v1623_v0  ;;  %1355 = vmatpush1.bf16.msra.mxu1 %v1354_v10  ;;  %v277_v0 = vld [vmem:[#allocation2 + $0x1c0] sm:$0xff]  ;;  %v1394_v6 = vpack.c.bf16 %v453_v3, %v451_v2  ;;  %v460_v10 = vld [vmem:[#allocation2 + $0x308] sm:$0xff] }
  0x4f   :  { %1357 = vmatprep.subr.bf16.mxu1 %v1356_v11  ;;  %v1362_v19 = vpack.c.bf16 %v279_v18, %v277_v0  ;;  %v462_v11 = vld [vmem:[#allocation2 + $0x318] sm:$0xff]  ;;  %v1402_v0 = vpack.c.bf16 %v461_v15, %v459_v14 }
  0x50   :  { %1391 = vmatpush1.bf16.msra.mxu0 %v1390_v63  ;;  %v1400_v13 = vpack.c.bf16 %v462_v11, %v460_v10 }
  0x51   :  { %199 = vmatmul.mubr.f32.gmra.mrb[14].mxu0 %v47_v9  ;;  %1393 = vmatprep.subr.bf16.mxu0 %v1392_v1  ;;  %v457_v9 = vld [vmem:[#allocation2 + $0x2f0] sm:$0xff] }
  0x52   :  { %1359 = vmatpush1.bf16.msra.mxu1 %v1358_v16  ;;  %v1398_v12 = vpack.c.bf16 %v457_v9, %v455_v8  ;;  %v464_v16 = vld [vmem:[#allocation2 + $0x328] sm:$0xff] }
  0x53   :  { %1361 = vmatprep.subr.bf16.mxu1 %v1360_v17  ;;  %v466_v17 = vld [vmem:[#allocation2 + $0x338] sm:$0xff] }
  0x54   :  { %1395 = vmatpush1.bf16.msra.mxu0 %v1394_v6  ;;  %v1404_v18 = vpack.c.bf16 %v466_v17, %v464_v16 }
  0x55   :  { %1397 = vmatprep.subr.bf16.mxu0 %v1396_v7 }
  0x56   :  { %1363 = vmatpush1.bf16.msra.mxu1 %v1362_v19  ;;  %v463_v19 = vld [vmem:[#allocation2 + $0x320] sm:$0xff] }
  0x57   :  { %1365 = vmatprep.subr.bf16.mxu1 %v1364_v22  ;;  %v470_v22 = vld [vmem:[#allocation2 + $0x358] sm:$0xff]  ;;  %v1406_v23 = vpack.c.bf16 %v465_v20, %v463_v19 }
  0x58   :  { %1399 = vmatpush1.bf16.msra.mxu0 %v1398_v12  ;;  %v1408_v24 = vpack.c.bf16 %v470_v22, %v468_v21 }
  0x59   :  { %1401 = vmatprep.subr.bf16.mxu0 %v1400_v13 }
  0x5a   :  { %1367 = vmatpush1.bf16.msra.mxu1 %v1366_v25  ;;  %v467_v25 = vld [vmem:[#allocation2 + $0x340] sm:$0xff] }
  0x5b   :  { %v1410_v29 = vpack.c.bf16 %v469_v26, %v467_v25 }
  0x5c   :  { %1403 = vmatpush1.bf16.msra.mxu0 %v1402_v0 }
  0x5d   :  { %1405 = vmatprep.subr.bf16.mxu0 %v1404_v18 }
  0x60   :  { %1407 = vmatpush1.bf16.msra.mxu0 %v1406_v23 }
  0x61   :  { %1409 = vmatprep.subr.bf16.mxu0 %v1408_v24 }
  0x64   :  { %1411 = vmatpush1.bf16.msra.mxu0 %v1410_v29 }
  0x65   :  { %1413 = vmatprep.subr.bf16.mxu0 %v1412_v30 }
  0x68   :  { %1415 = vmatpush1.bf16.msra.mxu0 %v1414_v35 }
  0x69   :  { %1417 = vmatprep.subr.bf16.mxu0 %v1416_v36 }
  0x6c   :  { %1419 = vmatpush1.bf16.msra.mxu0 %v1418_v41  ;;  %v485_v41 = vld [vmem:[#allocation2 + $0x3d0] sm:$0xff] }
  0x6d   :  { %1421 = vmatprep.subr.bf16.mxu0 %v1420_v42  ;;  %v1426_v42 = vpack.c.bf16 %v485_v41, %v483_v40  ;;  %v671_v40 = vld [vmem:[#allocation2 + $0x528] sm:$0xff]  ;;  %v673_v41 = vld [vmem:[#allocation2 + $0x538] sm:$0xff] }
  0x6e   :  { %v1468_v43 = vpack.c.bf16 %v673_v41, %v671_v40 }
  0x70   :  { %1423 = vmatpush1.bf16.msra.mxu0 %v1422_v47  ;;  %v489_v47 = vld [vmem:[#allocation2 + $0x3f0] sm:$0xff] }
  0x71   :  { %1425 = vmatprep.subr.bf16.mxu0 %v1424_v48  ;;  %v1430_v48 = vpack.c.bf16 %v489_v47, %v487_v46  ;;  %v675_v46 = vld [vmem:[#allocation2 + $0x548] sm:$0xff]  ;;  %v677_v47 = vld [vmem:[#allocation2 + $0x558] sm:$0xff] }
  0x74   :  { %1427 = vmatpush1.bf16.msra.mxu0 %v1426_v42 }
  0x75   :  { %1429 = vmatprep.subr.bf16.mxu0 %v1428_v45  ;;  %v672_v45 = vld [vmem:[#allocation2 + $0x530] sm:$0xff] }
  0x78   :  { %1431 = vmatpush1.bf16.msra.mxu0 %v1430_v48  ;;  %v1470_v48 = vpack.c.bf16 %v672_v45, %v670_v44 }
 0x108   :  { %v158_v56 = vpop.f32.mrb[0].mxu0 }
 0x109   :  { %v159_v57 = vadd.f32 %v158_v56, %v85_v54  ;;  %v160_v58 = vpop.f32.mrb[1].mxu0  ;;  %v639_v56 = vld [vmem:[#allocation2 + $0x428] sm:$0xff] }
 0x10a   :  { %v161_v59 = vadd.f32 %v160_v58, %v89_v55 }
 0x10b   :  { %v205_v62 = vmax.f32 %v159_v57, 0.0  ;;  %v641_v57 = vld [vmem:[#allocation2 + $0x438] sm:$0xff] }
 0x10c   :  { %v164_v60 = vpop.f32.mrb[2].mxu0  ;;  %v206_v61 = vmax.f32 %v161_v59, 0.0  ;;  %v1436_v59 = vpack.c.bf16 %v641_v57, %v639_v56 }
 0x10d   :  { %v165_v63 = vadd.f32 %v164_v60, %v85_v54  ;;  %v166_v1 = vpop.f32.mrb[3].mxu0  ;;  %v638_v60 = vld [vmem:[#allocation2 + $0x420] sm:$0xff] }
 0x10e   :  { %v167_v2 = vadd.f32 %v166_v1, %v89_v55  ;;  %361 = vmatprep.mubr.f32.mxu1 %v206_v61  ;;  %v640_v61 = vld [vmem:[#allocation2 + $0x430] sm:$0xff] }
 0x10f   :  { %362 = vmatmul.mubr.f32.vlgmr.msra.gmra.mrb[0].mxu1 %v205_v62  ;;  %v207_v5 = vmax.f32 %v165_v63, 0.0  ;;  %v643_v62 = vld [vmem:[#allocation2 + $0x448] sm:$0xff]  ;;  %v645_v63 = vld [vmem:[#allocation2 + $0x458] sm:$0xff]  ;;  %v1438_v1 = vpack.c.bf16 %v640_v61, %v638_v60 }
 0x110   :  { %v208_v3 = vmax.f32 %v167_v2, 0.0  ;;  %v170_v4 = vpop.f32.mrb[4].mxu0  ;;  %v1440_v2 = vpack.c.bf16 %v645_v63, %v643_v62  ;;  %v683_v60 = vld [vmem:[#allocation2 + $0x588] sm:$0xff]  ;;  %v685_v61 = vld [vmem:[#allocation2 + $0x598] sm:$0xff] }
 0x111   :  { %v171_v6 = vadd.f32 %v170_v4, %v85_v54  ;;  %v172_v7 = vpop.f32.mrb[5].mxu0  ;;  %v644_v4 = vld [vmem:[#allocation2 + $0x450] sm:$0xff]  ;;  %v1480_v63 = vpack.c.bf16 %v685_v61, %v683_v60 }
 0x112   :  { %v173_v8 = vadd.f32 %v172_v7, %v89_v55  ;;  %367 = vmatprep.mubr.f32.mxu1 %v208_v3  ;;  %v642_v3 = vld [vmem:[#allocation2 + $0x440] sm:$0xff] }
 0x113   :  { %368 = vmatmul.mubr.f32.gmra.mrb[2].mxu1 %v207_v5  ;;  %v209_v11 = vmax.f32 %v171_v6, 0.0  ;;  %v647_v5 = vld [vmem:[#allocation2 + $0x468] sm:$0xff]  ;;  %v649_v6 = vld [vmem:[#allocation2 + $0x478] sm:$0xff]  ;;  %v1442_v7 = vpack.c.bf16 %v644_v4, %v642_v3 }
 0x114   :  { %v210_v9 = vmax.f32 %v173_v8, 0.0  ;;  %v176_v10 = vpop.f32.mrb[6].mxu0  ;;  %v1444_v8 = vpack.c.bf16 %v649_v6, %v647_v5  ;;  %v687_v3 = vld [vmem:[#allocation2 + $0x5a8] sm:$0xff]  ;;  %v689_v4 = vld [vmem:[#allocation2 + $0x5b8] sm:$0xff] }
 0x115   :  { %v177_v12 = vadd.f32 %v176_v10, %v85_v54  ;;  %v178_v13 = vpop.f32.mrb[7].mxu0  ;;  %v648_v10 = vld [vmem:[#allocation2 + $0x470] sm:$0xff]  ;;  %v1484_v6 = vpack.c.bf16 %v689_v4, %v687_v3 }
 0x116   :  { %v179_v14 = vadd.f32 %v178_v13, %v89_v55  ;;  %373 = vmatprep.mubr.f32.mxu1 %v210_v9  ;;  %v646_v9 = vld [vmem:[#allocation2 + $0x460] sm:$0xff]  ;;  %v692_v3 = vld [vmem:[#allocation2 + $0x5d0] sm:$0xff] }
 0x117   :  { %374 = vmatmul.mubr.f32.gmra.mrb[4].mxu1 %v209_v11  ;;  %v211_v17 = vmax.f32 %v177_v12, 0.0  ;;  %v651_v11 = vld [vmem:[#allocation2 + $0x488] sm:$0xff]  ;;  %v653_v12 = vld [vmem:[#allocation2 + $0x498] sm:$0xff]  ;;  %v1446_v13 = vpack.c.bf16 %v648_v10, %v646_v9 }
 0x118   :  { %v212_v15 = vmax.f32 %v179_v14, 0.0  ;;  %v182_v16 = vpop.f32.mrb[8].mxu0  ;;  %v1448_v14 = vpack.c.bf16 %v653_v12, %v651_v11  ;;  %v691_v9 = vld [vmem:[#allocation2 + $0x5c8] sm:$0xff]  ;;  %v693_v10 = vld [vmem:[#allocation2 + $0x5d8] sm:$0xff] }
 0x119   :  { %v183_v0 = vadd.f32 %v182_v16, %v85_v54  ;;  %v184_v18 = vpop.f32.mrb[9].mxu0  ;;  %v652_v16 = vld [vmem:[#allocation2 + $0x490] sm:$0xff]  ;;  %v1488_v12 = vpack.c.bf16 %v693_v10, %v691_v9 }
 0x11a   :  { %v185_v19 = vadd.f32 %v184_v18, %v89_v55  ;;  %379 = vmatprep.mubr.f32.mxu1 %v212_v15  ;;  %v650_v15 = vld [vmem:[#allocation2 + $0x480] sm:$0xff]  ;;  %v696_v9 = vld [vmem:[#allocation2 + $0x5f0] sm:$0xff] }
 0x11b   :  { %380 = vmatmul.mubr.f32.gmra.mrb[6].mxu1 %v211_v17  ;;  %v213_v22 = vmax.f32 %v183_v0, 0.0  ;;  %v655_v17 = vld [vmem:[#allocation2 + $0x4a8] sm:$0xff]  ;;  %v657_v0 = vld [vmem:[#allocation2 + $0x4b8] sm:$0xff]  ;;  %v1450_v18 = vpack.c.bf16 %v652_v16, %v650_v15 }
 0x11c   :  { %v214_v20 = vmax.f32 %v185_v19, 0.0  ;;  %v188_v21 = vpop.f32.mrb[10].mxu0  ;;  %v1452_v19 = vpack.c.bf16 %v657_v0, %v655_v17 }
 0x11d   :  { %v189_v23 = vadd.f32 %v188_v21, %v85_v54  ;;  %v190_v24 = vpop.f32.mrb[11].mxu0  ;;  %v656_v21 = vld [vmem:[#allocation2 + $0x4b0] sm:$0xff] }
 0x11e   :  { %v191_v25 = vadd.f32 %v190_v24, %v89_v55  ;;  %385 = vmatprep.mubr.f32.mxu1 %v214_v20  ;;  %v654_v20 = vld [vmem:[#allocation2 + $0x4a0] sm:$0xff] }
 0x11f   :  { %386 = vmatmul.mubr.f32.gmra.mrb[8].mxu1 %v213_v22  ;;  %v215_v28 = vmax.f32 %v189_v23, 0.0  ;;  %v659_v22 = vld [vmem:[#allocation2 + $0x4c8] sm:$0xff]  ;;  %v661_v23 = vld [vmem:[#allocation2 + $0x4d8] sm:$0xff]  ;;  %v1454_v24 = vpack.c.bf16 %v656_v21, %v654_v20 }
 0x120   :  { %v216_v26 = vmax.f32 %v191_v25, 0.0  ;;  %v194_v27 = vpop.f32.mrb[12].mxu0  ;;  %v1456_v25 = vpack.c.bf16 %v661_v23, %v659_v22 }
 0x121   :  { %v195_v29 = vadd.f32 %v194_v27, %v85_v54  ;;  %v196_v30 = vpop.f32.mrb[13].mxu0  ;;  %v660_v27 = vld [vmem:[#allocation2 + $0x4d0] sm:$0xff] }
 0x122   :  { %v197_v31 = vadd.f32 %v196_v30, %v89_v55  ;;  %391 = vmatprep.mubr.f32.mxu1 %v216_v26  ;;  %v658_v26 = vld [vmem:[#allocation2 + $0x4c0] sm:$0xff] }
 0x123   :  { %392 = vmatmul.mubr.f32.gmra.mrb[10].mxu1 %v215_v28  ;;  %v217_v34 = vmax.f32 %v195_v29, 0.0  ;;  %v663_v28 = vld [vmem:[#allocation2 + $0x4e8] sm:$0xff]  ;;  %v665_v29 = vld [vmem:[#allocation2 + $0x4f8] sm:$0xff]  ;;  %v1458_v30 = vpack.c.bf16 %v660_v27, %v658_v26 }
 0x124   :  { %v218_v32 = vmax.f32 %v197_v31, 0.0  ;;  %v200_v33 = vpop.f32.mrb[14].mxu0  ;;  %v1460_v31 = vpack.c.bf16 %v665_v29, %v663_v28 }
 0x125   :  { %v201_v35 = vadd.f32 %v200_v33, %v85_v54  ;;  %v202_v36 = vpop.f32.mrb[15].mxu0  ;;  %v1432_v54 = vpack.c.bf16 %v637_v50, %v635_v49  ;;  %v664_v33 = vld [vmem:[#allocation2 + $0x4f0] sm:$0xff]  ;;  %v1472_v49 = vpack.c.bf16 %v677_v47, %v675_v46  ;;  %v674_v50 = vld [vmem:[#allocation2 + $0x540] sm:$0xff] }
 0x126   :  { %v203_v37 = vadd.f32 %v202_v36, %v89_v55  ;;  %397 = vmatprep.mubr.f32.mxu1 %v218_v32  ;;  %v636_v55 = vld [vmem:[#allocation2 + $0x410] sm:$0xff]  ;;  %v662_v32 = vld [vmem:[#allocation2 + $0x4e0] sm:$0xff] }
 0x127   :  { %398 = vmatmul.mubr.f32.gmra.mrb[12].mxu1 %v217_v34  ;;  %v219_v39 = vmax.f32 %v201_v35, 0.0  ;;  %v1434_v58 = vpack.c.bf16 %v636_v55, %v634_v52  ;;  %1433 = vmatprep.subr.bf16.mxu1 %v1432_v54  ;;  %v667_v34 = vld [vmem:[#allocation2 + $0x508] sm:$0xff]  ;;  %v669_v35 = vld [vmem:[#allocation2 + $0x518] sm:$0xff]  ;;  %v1462_v36 = vpack.c.bf16 %v664_v33, %v662_v32  ;;  %v676_v52 = vld [vmem:[#allocation2 + $0x550] sm:$0xff] }
 0x128   :  { %v220_v38 = vmax.f32 %v203_v37, 0.0  ;;  %v1464_v37 = vpack.c.bf16 %v669_v35, %v667_v34  ;;  %v679_v54 = vld [vmem:[#allocation2 + $0x568] sm:$0xff]  ;;  %v681_v55 = vld [vmem:[#allocation2 + $0x578] sm:$0xff]  ;;  %v1474_v56 = vpack.c.bf16 %v676_v52, %v674_v50 }
 0x129   :  { %1435 = vmatpush1.bf16.msra.mxu1 %v1434_v58  ;;  %v1476_v57 = vpack.c.bf16 %v681_v55, %v679_v54  ;;  %v678_v58 = vld [vmem:[#allocation2 + $0x560] sm:$0xff] }
 0x12a   :  { %403 = vmatprep.mubr.f32.mxu1 %v220_v38  ;;  %1437 = vmatprep.subr.bf16.mxu1 %v1436_v59  ;;  %v666_v38 = vld [vmem:[#allocation2 + $0x500] sm:$0xff]  ;;  %v680_v59 = vld [vmem:[#allocation2 + $0x570] sm:$0xff] }
 0x12b   :  { %404 = vmatmul.mubr.f32.gmra.mrb[14].mxu1 %v219_v39  ;;  %v668_v39 = vld [vmem:[#allocation2 + $0x510] sm:$0xff]  ;;  %v1478_v62 = vpack.c.bf16 %v680_v59, %v678_v58 }
 0x12c   :  { %v1466_v42 = vpack.c.bf16 %v668_v39, %v666_v38 }
 0x12d   :  { %1439 = vmatpush1.bf16.msra.mxu1 %v1438_v1  ;;  %v682_v1 = vld [vmem:[#allocation2 + $0x580] sm:$0xff] }
 0x12e   :  { %1441 = vmatprep.subr.bf16.mxu1 %v1440_v2  ;;  %v684_v2 = vld [vmem:[#allocation2 + $0x590] sm:$0xff] }
 0x12f   :  { %v1482_v5 = vpack.c.bf16 %v684_v2, %v682_v1  ;;  %v690_v2 = vld [vmem:[#allocation2 + $0x5c0] sm:$0xff] }
 0x130   :  { %v1490_v4 = vpack.c.bf16 %v692_v3, %v690_v2  ;;  %v878_v2 = vld [vmem:[#allocation2 + $0x728] sm:$0xff]  ;;  %v880_v3 = vld [vmem:[#allocation2 + $0x738] sm:$0xff] }
 0x131   :  { %1443 = vmatpush1.bf16.msra.mxu1 %v1442_v7  ;;  %v686_v7 = vld [vmem:[#allocation2 + $0x5a0] sm:$0xff] }
 0x132   :  { %1445 = vmatprep.subr.bf16.mxu1 %v1444_v8  ;;  %v688_v8 = vld [vmem:[#allocation2 + $0x5b0] sm:$0xff] }
 0x133   :  { %v1486_v11 = vpack.c.bf16 %v688_v8, %v686_v7  ;;  %v694_v8 = vld [vmem:[#allocation2 + $0x5e0] sm:$0xff] }
 0x134   :  { %v1494_v10 = vpack.c.bf16 %v696_v9, %v694_v8  ;;  %v882_v8 = vld [vmem:[#allocation2 + $0x748] sm:$0xff]  ;;  %v884_v9 = vld [vmem:[#allocation2 + $0x758] sm:$0xff] }
 0x135   :  { %1447 = vmatpush1.bf16.msra.mxu1 %v1446_v13  ;;  %v285_v13 = vld [vmem:[%s1960_s4] sm:$0x3] }
 0x136   :  { %1449 = vmatprep.subr.bf16.mxu1 %v1448_v14  ;;  %v290_v14 = vrot.slane %v285_v13, %v1804_v51  ;;  %v294_v15 = vrot.slane %v285_v13, %v1809_v53  ;;  %v841_v13 = vld [vmem:[#allocation2 + $0x600] sm:$0xff] }
 0x139   :  { %1451 = vmatpush1.bf16.msra.mxu1 %v1450_v18 }
 0x13a   :  { %1453 = vmatprep.subr.bf16.mxu1 %v1452_v19 }
 0x13d   :  { %1455 = vmatpush1.bf16.msra.mxu1 %v1454_v24 }
 0x13e   :  { %1457 = vmatprep.subr.bf16.mxu1 %v1456_v25 }
 0x141   :  { %1459 = vmatpush1.bf16.msra.mxu1 %v1458_v30 }
 0x142   :  { %1461 = vmatprep.subr.bf16.mxu1 %v1460_v31 }
 0x145   :  { %1463 = vmatpush1.bf16.msra.mxu1 %v1462_v36 }
 0x146   :  { %1465 = vmatprep.subr.bf16.mxu1 %v1464_v37 }
 0x149   :  { %1467 = vmatpush1.bf16.msra.mxu1 %v1466_v42 }
 0x14a   :  { %1469 = vmatprep.subr.bf16.mxu1 %v1468_v43 }
 0x14d   :  { %1471 = vmatpush1.bf16.msra.mxu1 %v1470_v48 }
 0x14e   :  { %1473 = vmatprep.subr.bf16.mxu1 %v1472_v49 }
 0x151   :  { %1475 = vmatpush1.bf16.msra.mxu1 %v1474_v56 }
 0x152   :  { %1477 = vmatprep.subr.bf16.mxu1 %v1476_v57 }
 0x155   :  { %1479 = vmatpush1.bf16.msra.mxu1 %v1478_v62 }
 0x156   :  { %1481 = vmatprep.subr.bf16.mxu1 %v1480_v63 }
 0x159   :  { %1483 = vmatpush1.bf16.msra.mxu1 %v1482_v5  ;;  %v695_v5 = vld [vmem:[#allocation2 + $0x5e8] sm:$0xff] }
 0x15a   :  { %1485 = vmatprep.subr.bf16.mxu1 %v1484_v6  ;;  %v697_v6 = vld [vmem:[#allocation2 + $0x5f8] sm:$0xff] }
 0x15b   :  { %v1492_v7 = vpack.c.bf16 %v697_v6, %v695_v5  ;;  %v1532_v5 = vpack.c.bf16 %v880_v3, %v878_v2  ;;  %v877_v6 = vld [vmem:[#allocation2 + $0x720] sm:$0xff] }
 0x15d   :  { %1487 = vmatpush1.bf16.msra.mxu1 %v1486_v11  ;;  %v842_v11 = vld [vmem:[#allocation2 + $0x608] sm:$0xff] }
 0x15e   :  { %1489 = vmatprep.subr.bf16.mxu1 %v1488_v12  ;;  %v844_v12 = vld [vmem:[#allocation2 + $0x618] sm:$0xff] }
 0x161   :  { %1491 = vmatpush1.bf16.msra.mxu1 %v1490_v4 }
 0x162   :  { %1493 = vmatprep.subr.bf16.mxu1 %v1492_v7  ;;  %v879_v7 = vld [vmem:[#allocation2 + $0x730] sm:$0xff] }
 0x165   :  { %1495 = vmatpush1.bf16.msra.mxu1 %v1494_v10  ;;  %v1534_v10 = vpack.c.bf16 %v879_v7, %v877_v6 }
 0x1e2   :  { %v363_v16 = vpop.f32.mrb[0].mxu1 }
 0x1e3   :  { %v364_v17 = vadd.f32 %v363_v16, %v290_v14  ;;  %v365_v0 = vpop.f32.mrb[1].mxu1  ;;  %v846_v16 = vld [vmem:[#allocation2 + $0x628] sm:$0xff] }
 0x1e4   :  { %v366_v18 = vadd.f32 %v365_v0, %v294_v15 }
 0x1e5   :  { %v410_v21 = vmax.f32 %v364_v17, 0.0  ;;  %v848_v17 = vld [vmem:[#allocation2 + $0x638] sm:$0xff] }
 0x1e6   :  { %v411_v19 = vmax.f32 %v366_v18, 0.0  ;;  %v369_v20 = vpop.f32.mrb[2].mxu1  ;;  %v1500_v18 = vpack.c.bf16 %v848_v17, %v846_v16 }
 0x1e7   :  { %v370_v22 = vadd.f32 %v369_v20, %v290_v14  ;;  %v371_v23 = vpop.f32.mrb[3].mxu1  ;;  %v847_v20 = vld [vmem:[#allocation2 + $0x630] sm:$0xff] }
 0x1e8   :  { %v372_v24 = vadd.f32 %v371_v23, %v294_v15  ;;  %568 = vmatprep.mubr.f32.mxu0 %v411_v19  ;;  %v845_v19 = vld [vmem:[#allocation2 + $0x620] sm:$0xff] }
 0x1e9   :  { %569 = vmatmul.mubr.f32.vlgmr.msra.gmra.mrb[16].mxu0 %v410_v21  ;;  %v412_v27 = vmax.f32 %v370_v22, 0.0  ;;  %v850_v21 = vld [vmem:[#allocation2 + $0x648] sm:$0xff]  ;;  %v852_v22 = vld [vmem:[#allocation2 + $0x658] sm:$0xff]  ;;  %v1502_v23 = vpack.c.bf16 %v847_v20, %v845_v19 }
 0x1ea   :  { %v413_v25 = vmax.f32 %v372_v24, 0.0  ;;  %v375_v26 = vpop.f32.mrb[4].mxu1  ;;  %v1504_v24 = vpack.c.bf16 %v852_v22, %v850_v21  ;;  %v890_v19 = vld [vmem:[#allocation2 + $0x788] sm:$0xff]  ;;  %v892_v20 = vld [vmem:[#allocation2 + $0x798] sm:$0xff] }
 0x1eb   :  { %v376_v28 = vadd.f32 %v375_v26, %v290_v14  ;;  %v377_v29 = vpop.f32.mrb[5].mxu1  ;;  %v851_v26 = vld [vmem:[#allocation2 + $0x650] sm:$0xff]  ;;  %v1544_v22 = vpack.c.bf16 %v892_v20, %v890_v19 }
 0x1ec   :  { %v378_v30 = vadd.f32 %v377_v29, %v294_v15  ;;  %574 = vmatprep.mubr.f32.mxu0 %v413_v25  ;;  %v849_v25 = vld [vmem:[#allocation2 + $0x640] sm:$0xff] }
 0x1ed   :  { %575 = vmatmul.mubr.f32.gmra.mrb[18].mxu0 %v412_v27  ;;  %v414_v33 = vmax.f32 %v376_v28, 0.0  ;;  %v854_v27 = vld [vmem:[#allocation2 + $0x668] sm:$0xff]  ;;  %v856_v28 = vld [vmem:[#allocation2 + $0x678] sm:$0xff]  ;;  %v1506_v29 = vpack.c.bf16 %v851_v26, %v849_v25 }
 0x1ee   :  { %v415_v31 = vmax.f32 %v378_v30, 0.0  ;;  %v381_v32 = vpop.f32.mrb[6].mxu1  ;;  %v1508_v30 = vpack.c.bf16 %v856_v28, %v854_v27  ;;  %v894_v25 = vld [vmem:[#allocation2 + $0x7a8] sm:$0xff]  ;;  %v896_v26 = vld [vmem:[#allocation2 + $0x7b8] sm:$0xff] }
 0x1ef   :  { %v382_v34 = vadd.f32 %v381_v32, %v290_v14  ;;  %v383_v35 = vpop.f32.mrb[7].mxu1  ;;  %v855_v32 = vld [vmem:[#allocation2 + $0x670] sm:$0xff]  ;;  %v1548_v28 = vpack.c.bf16 %v896_v26, %v894_v25 }
 0x1f0   :  { %v384_v36 = vadd.f32 %v383_v35, %v294_v15  ;;  %580 = vmatprep.mubr.f32.mxu0 %v415_v31  ;;  %v853_v31 = vld [vmem:[#allocation2 + $0x660] sm:$0xff]  ;;  %v899_v25 = vld [vmem:[#allocation2 + $0x7d0] sm:$0xff] }
 0x1f1   :  { %581 = vmatmul.mubr.f32.gmra.mrb[20].mxu0 %v414_v33  ;;  %v416_v39 = vmax.f32 %v382_v34, 0.0  ;;  %v858_v33 = vld [vmem:[#allocation2 + $0x688] sm:$0xff]  ;;  %v860_v34 = vld [vmem:[#allocation2 + $0x698] sm:$0xff]  ;;  %v1510_v35 = vpack.c.bf16 %v855_v32, %v853_v31 }
 0x1f2   :  { %v417_v37 = vmax.f32 %v384_v36, 0.0  ;;  %v387_v38 = vpop.f32.mrb[8].mxu1  ;;  %v1512_v36 = vpack.c.bf16 %v860_v34, %v858_v33  ;;  %v898_v31 = vld [vmem:[#allocation2 + $0x7c8] sm:$0xff]  ;;  %v900_v32 = vld [vmem:[#allocation2 + $0x7d8] sm:$0xff] }
 0x1f3   :  { %v388_v40 = vadd.f32 %v387_v38, %v290_v14  ;;  %v389_v41 = vpop.f32.mrb[9].mxu1  ;;  %v859_v38 = vld [vmem:[#allocation2 + $0x690] sm:$0xff]  ;;  %v1552_v34 = vpack.c.bf16 %v900_v32, %v898_v31 }
 0x1f4   :  { %v390_v42 = vadd.f32 %v389_v41, %v294_v15  ;;  %586 = vmatprep.mubr.f32.mxu0 %v417_v37  ;;  %v857_v37 = vld [vmem:[#allocation2 + $0x680] sm:$0xff]  ;;  %v903_v31 = vld [vmem:[#allocation2 + $0x7f0] sm:$0xff] }
 0x1f5   :  { %587 = vmatmul.mubr.f32.gmra.mrb[22].mxu0 %v416_v39  ;;  %v418_v45 = vmax.f32 %v388_v40, 0.0  ;;  %v862_v39 = vld [vmem:[#allocation2 + $0x6a8] sm:$0xff]  ;;  %v864_v40 = vld [vmem:[#allocation2 + $0x6b8] sm:$0xff]  ;;  %v1514_v41 = vpack.c.bf16 %v859_v38, %v857_v37 }
 0x1f6   :  { %v419_v43 = vmax.f32 %v390_v42, 0.0  ;;  %v393_v44 = vpop.f32.mrb[10].mxu1  ;;  %v1516_v42 = vpack.c.bf16 %v864_v40, %v862_v39 }
 0x1f7   :  { %v394_v46 = vadd.f32 %v393_v44, %v290_v14  ;;  %v395_v47 = vpop.f32.mrb[11].mxu1  ;;  %v863_v44 = vld [vmem:[#allocation2 + $0x6b0] sm:$0xff] }
 0x1f8   :  { %v396_v48 = vadd.f32 %v395_v47, %v294_v15  ;;  %592 = vmatprep.mubr.f32.mxu0 %v419_v43  ;;  %v861_v43 = vld [vmem:[#allocation2 + $0x6a0] sm:$0xff] }
 0x1f9   :  { %593 = vmatmul.mubr.f32.gmra.mrb[24].mxu0 %v418_v45  ;;  %v420_v52 = vmax.f32 %v394_v46, 0.0  ;;  %v866_v45 = vld [vmem:[#allocation2 + $0x6c8] sm:$0xff]  ;;  %v868_v46 = vld [vmem:[#allocation2 + $0x6d8] sm:$0xff]  ;;  %v1518_v47 = vpack.c.bf16 %v863_v44, %v861_v43 }
 0x1fa   :  { %v421_v49 = vmax.f32 %v396_v48, 0.0  ;;  %v399_v50 = vpop.f32.mrb[12].mxu1  ;;  %v1520_v48 = vpack.c.bf16 %v868_v46, %v866_v45 }
 0x1fb   :  { %v400_v54 = vadd.f32 %v399_v50, %v290_v14  ;;  %v401_v55 = vpop.f32.mrb[13].mxu1  ;;  %v867_v50 = vld [vmem:[#allocation2 + $0x6d0] sm:$0xff] }
 0x1fc   :  { %v402_v56 = vadd.f32 %v401_v55, %v294_v15  ;;  %598 = vmatprep.mubr.f32.mxu0 %v421_v49  ;;  %v865_v49 = vld [vmem:[#allocation2 + $0x6c0] sm:$0xff] }
 0x1fd   :  { %599 = vmatmul.mubr.f32.gmra.mrb[26].mxu0 %v420_v52  ;;  %v422_v59 = vmax.f32 %v400_v54, 0.0  ;;  %v870_v52 = vld [vmem:[#allocation2 + $0x6e8] sm:$0xff]  ;;  %v872_v54 = vld [vmem:[#allocation2 + $0x6f8] sm:$0xff]  ;;  %v1522_v55 = vpack.c.bf16 %v867_v50, %v865_v49 }
 0x1fe   :  { %v423_v57 = vmax.f32 %v402_v56, 0.0  ;;  %v405_v58 = vpop.f32.mrb[14].mxu1  ;;  %v1524_v56 = vpack.c.bf16 %v872_v54, %v870_v52 }
 0x1ff   :  { %v406_v60 = vadd.f32 %v405_v58, %v290_v14  ;;  %v407_v61 = vpop.f32.mrb[15].mxu1  ;;  %v1496_v14 = vpack.c.bf16 %v844_v12, %v842_v11  ;;  %v871_v58 = vld [vmem:[#allocation2 + $0x6f0] sm:$0xff]  ;;  %v1536_v11 = vpack.c.bf16 %v884_v9, %v882_v8  ;;  %v881_v12 = vld [vmem:[#allocation2 + $0x740] sm:$0xff] }
 0x200   :  { %v408_v62 = vadd.f32 %v407_v61, %v294_v15  ;;  %604 = vmatprep.mubr.f32.mxu0 %v423_v57  ;;  %v843_v15 = vld [vmem:[#allocation2 + $0x610] sm:$0xff]  ;;  %v869_v57 = vld [vmem:[#allocation2 + $0x6e0] sm:$0xff] }
 0x201   :  { %605 = vmatmul.mubr.f32.gmra.mrb[28].mxu0 %v422_v59  ;;  %v424_v1 = vmax.f32 %v406_v60, 0.0  ;;  %v1498_v0 = vpack.c.bf16 %v843_v15, %v841_v13  ;;  %1497 = vmatprep.subr.bf16.mxu0 %v1496_v14  ;;  %v874_v59 = vld [vmem:[#allocation2 + $0x708] sm:$0xff]  ;;  %v876_v60 = vld [vmem:[#allocation2 + $0x718] sm:$0xff]  ;;  %v1526_v61 = vpack.c.bf16 %v871_v58, %v869_v57  ;;  %v883_v13 = vld [vmem:[#allocation2 + $0x750] sm:$0xff] }
 0x202   :  { %v425_v63 = vmax.f32 %v408_v62, 0.0  ;;  %v1528_v62 = vpack.c.bf16 %v876_v60, %v874_v59  ;;  %v886_v14 = vld [vmem:[#allocation2 + $0x768] sm:$0xff]  ;;  %v888_v15 = vld [vmem:[#allocation2 + $0x778] sm:$0xff]  ;;  %v1538_v16 = vpack.c.bf16 %v883_v13, %v881_v12 }
 0x203   :  { %1499 = vmatpush1.bf16.msra.mxu0 %v1498_v0  ;;  %v1540_v17 = vpack.c.bf16 %v888_v15, %v886_v14  ;;  %v885_v0 = vld [vmem:[#allocation2 + $0x760] sm:$0xff] }
 0x204   :  { %610 = vmatprep.mubr.f32.mxu0 %v425_v63  ;;  %1501 = vmatprep.subr.bf16.mxu0 %v1500_v18  ;;  %v873_v63 = vld [vmem:[#allocation2 + $0x700] sm:$0xff]  ;;  %v887_v18 = vld [vmem:[#allocation2 + $0x770] sm:$0xff] }
 0x205   :  { %611 = vmatmul.mubr.f32.gmra.mrb[30].mxu0 %v424_v1  ;;  %v875_v1 = vld [vmem:[#allocation2 + $0x710] sm:$0xff]  ;;  %v1542_v21 = vpack.c.bf16 %v887_v18, %v885_v0 }
 0x206   :  { %v1530_v4 = vpack.c.bf16 %v875_v1, %v873_v63 }
 0x207   :  { %1503 = vmatpush1.bf16.msra.mxu0 %v1502_v23  ;;  %v889_v23 = vld [vmem:[#allocation2 + $0x780] sm:$0xff] }
 0x208   :  { %1505 = vmatprep.subr.bf16.mxu0 %v1504_v24  ;;  %v891_v24 = vld [vmem:[#allocation2 + $0x790] sm:$0xff] }
 0x209   :  { %v1546_v27 = vpack.c.bf16 %v891_v24, %v889_v23  ;;  %v897_v24 = vld [vmem:[#allocation2 + $0x7c0] sm:$0xff] }
 0x20a   :  { %v1554_v26 = vpack.c.bf16 %v899_v25, %v897_v24 }
 0x20b   :  { %1507 = vmatpush1.bf16.msra.mxu0 %v1506_v29  ;;  %v893_v29 = vld [vmem:[#allocation2 + $0x7a0] sm:$0xff] }
 0x20c   :  { %1509 = vmatprep.subr.bf16.mxu0 %v1508_v30  ;;  %v895_v30 = vld [vmem:[#allocation2 + $0x7b0] sm:$0xff] }
 0x20d   :  { %v1550_v33 = vpack.c.bf16 %v895_v30, %v893_v29  ;;  %v901_v30 = vld [vmem:[#allocation2 + $0x7e0] sm:$0xff] }
 0x20e   :  { %v1558_v32 = vpack.c.bf16 %v903_v31, %v901_v30 }
 0x20f   :  { %1511 = vmatpush1.bf16.msra.mxu0 %v1510_v35  ;;  %v1212_v35 = vld [vmem:[%s1960_s4 + $0x2] sm:$0x3] }
 0x210   :  { %1513 = vmatprep.subr.bf16.mxu0 %v1512_v36  ;;  %v497_v36 = vrot.slane %v1212_v35, %v1804_v51  ;;  %v501_v37 = vrot.slane %v1212_v35, %v1809_v53  ;;  %v1047_v35 = vld [vmem:[%s1961_s5] sm:$0xff] }
 0x213   :  { %1515 = vmatpush1.bf16.msra.mxu0 %v1514_v41 }
 0x214   :  { %1517 = vmatprep.subr.bf16.mxu0 %v1516_v42 }
 0x217   :  { %1519 = vmatpush1.bf16.msra.mxu0 %v1518_v47 }
 0x218   :  { %1521 = vmatprep.subr.bf16.mxu0 %v1520_v48 }
 0x21b   :  { %1523 = vmatpush1.bf16.msra.mxu0 %v1522_v55 }
 0x21c   :  { %1525 = vmatprep.subr.bf16.mxu0 %v1524_v56 }
 0x21f   :  { %1527 = vmatpush1.bf16.msra.mxu0 %v1526_v61 }
 0x220   :  { %1529 = vmatprep.subr.bf16.mxu0 %v1528_v62 }
 0x223   :  { %1531 = vmatpush1.bf16.msra.mxu0 %v1530_v4 }
 0x224   :  { %1533 = vmatprep.subr.bf16.mxu0 %v1532_v5 }
 0x227   :  { %1535 = vmatpush1.bf16.msra.mxu0 %v1534_v10 }
 0x228   :  { %1537 = vmatprep.subr.bf16.mxu0 %v1536_v11 }
 0x22b   :  { %1539 = vmatpush1.bf16.msra.mxu0 %v1538_v16 }
 0x22c   :  { %1541 = vmatprep.subr.bf16.mxu0 %v1540_v17 }
 0x22f   :  { %1543 = vmatpush1.bf16.msra.mxu0 %v1542_v21 }
 0x230   :  { %1545 = vmatprep.subr.bf16.mxu0 %v1544_v22 }
 0x233   :  { %1547 = vmatpush1.bf16.msra.mxu0 %v1546_v27  ;;  %v902_v27 = vld [vmem:[#allocation2 + $0x7e8] sm:$0xff] }
 0x234   :  { %1549 = vmatprep.subr.bf16.mxu0 %v1548_v28  ;;  %v904_v28 = vld [vmem:[#allocation2 + $0x7f8] sm:$0xff] }
 0x235   :  { %v1556_v29 = vpack.c.bf16 %v904_v28, %v902_v27 }
 0x237   :  { %1551 = vmatpush1.bf16.msra.mxu0 %v1550_v33  ;;  %v1063_v33 = vld [vmem:[%s1961_s5 + $0x80] sm:$0xff] }
 0x238   :  { %1553 = vmatprep.subr.bf16.mxu0 %v1552_v34  ;;  %v1064_v34 = vld [vmem:[%s1961_s5 + $0x88] sm:$0xff] }
 0x23b   :  { %1555 = vmatpush1.bf16.msra.mxu0 %v1554_v26 }
 0x23c   :  { %1557 = vmatprep.subr.bf16.mxu0 %v1556_v29 }
 0x23f   :  { %1559 = vmatpush1.bf16.msra.mxu0 %v1558_v32 }
 0x2bc   :  { %v570_v38 = vpop.f32.mrb[16].mxu0 }
 0x2bd   :  { %v571_v39 = vadd.f32 %v570_v38, %v497_v36  ;;  %v572_v40 = vpop.f32.mrb[17].mxu0  ;;  %v1065_v38 = vld [vmem:[%s1961_s5 + $0x90] sm:$0xff] }
 0x2be   :  { %v573_v41 = vadd.f32 %v572_v40, %v501_v37 }
 0x2bf   :  { %v617_v44 = vmax.f32 %v571_v39, 0.0  ;;  %v1066_v39 = vld [vmem:[%s1961_s5 + $0x98] sm:$0xff] }
 0x2c0   :  { %v618_v42 = vmax.f32 %v573_v41, 0.0  ;;  %v576_v43 = vpop.f32.mrb[18].mxu0  ;;  %v1564_v41 = vpack.c.bf16 %v1066_v39, %v1065_v38 }
 0x2c1   :  { %v577_v45 = vadd.f32 %v576_v43, %v497_v36  ;;  %v578_v46 = vpop.f32.mrb[19].mxu0  ;;  %v1050_v43 = vld [vmem:[%s1961_s5 + $0x18] sm:$0xff] }
 0x2c2   :  { %v579_v47 = vadd.f32 %v578_v46, %v501_v37  ;;  %775 = vmatprep.mubr.f32.mxu1 %v618_v42  ;;  %v1049_v42 = vld [vmem:[%s1961_s5 + $0x10] sm:$0xff] }
 0x2c3   :  { %776 = vmatmul.mubr.f32.vlgmr.msra.gmra.mrb[16].mxu1 %v617_v44  ;;  %v619_v50 = vmax.f32 %v577_v45, 0.0  ;;  %v1067_v44 = vld [vmem:[%s1961_s5 + $0xa0] sm:$0xff]  ;;  %v1068_v45 = vld [vmem:[%s1961_s5 + $0xa8] sm:$0xff]  ;;  %v1566_v46 = vpack.c.bf16 %v1050_v43, %v1049_v42 }
 0x2c4   :  { %v620_v48 = vmax.f32 %v579_v47, 0.0  ;;  %v582_v49 = vpop.f32.mrb[20].mxu0  ;;  %v1568_v47 = vpack.c.bf16 %v1068_v45, %v1067_v44 }
 0x2c5   :  { %v583_v52 = vadd.f32 %v582_v49, %v497_v36  ;;  %v584_v54 = vpop.f32.mrb[21].mxu0  ;;  %v1052_v49 = vld [vmem:[%s1961_s5 + $0x28] sm:$0xff] }
 0x2c6   :  { %v585_v55 = vadd.f32 %v584_v54, %v501_v37  ;;  %781 = vmatprep.mubr.f32.mxu1 %v620_v48  ;;  %v1051_v48 = vld [vmem:[%s1961_s5 + $0x20] sm:$0xff] }
 0x2c7   :  { %782 = vmatmul.mubr.f32.gmra.mrb[18].mxu1 %v619_v50  ;;  %v621_v58 = vmax.f32 %v583_v52, 0.0  ;;  %v1069_v50 = vld [vmem:[%s1961_s5 + $0xb0] sm:$0xff]  ;;  %v1070_v52 = vld [vmem:[%s1961_s5 + $0xb8] sm:$0xff]  ;;  %v1570_v54 = vpack.c.bf16 %v1052_v49, %v1051_v48 }
 0x2c8   :  { %v622_v56 = vmax.f32 %v585_v55, 0.0  ;;  %v588_v57 = vpop.f32.mrb[22].mxu0  ;;  %v1572_v55 = vpack.c.bf16 %v1070_v52, %v1069_v50 }
 0x2c9   :  { %v589_v59 = vadd.f32 %v588_v57, %v497_v36  ;;  %v590_v60 = vpop.f32.mrb[23].mxu0  ;;  %v1054_v57 = vld [vmem:[%s1961_s5 + $0x38] sm:$0xff] }
 0x2ca   :  { %v591_v61 = vadd.f32 %v590_v60, %v501_v37  ;;  %787 = vmatprep.mubr.f32.mxu1 %v622_v56  ;;  %v1053_v56 = vld [vmem:[%s1961_s5 + $0x30] sm:$0xff] }
 0x2cb   :  { %788 = vmatmul.mubr.f32.gmra.mrb[20].mxu1 %v621_v58  ;;  %v623_v1 = vmax.f32 %v589_v59, 0.0  ;;  %v1071_v58 = vld [vmem:[%s1961_s5 + $0xc0] sm:$0xff]  ;;  %v1072_v59 = vld [vmem:[%s1961_s5 + $0xc8] sm:$0xff]  ;;  %v1574_v60 = vpack.c.bf16 %v1054_v57, %v1053_v56 }
 0x2cc   :  { %v624_v62 = vmax.f32 %v591_v61, 0.0  ;;  %v594_v63 = vpop.f32.mrb[24].mxu0  ;;  %v1576_v61 = vpack.c.bf16 %v1072_v59, %v1071_v58 }
 0x2cd   :  { %v595_v2 = vadd.f32 %v594_v63, %v497_v36  ;;  %v596_v3 = vpop.f32.mrb[25].mxu0  ;;  %v1056_v63 = vld [vmem:[%s1961_s5 + $0x48] sm:$0xff] }
 0x2ce   :  { %v597_v4 = vadd.f32 %v596_v3, %v501_v37  ;;  %793 = vmatprep.mubr.f32.mxu1 %v624_v62  ;;  %v1055_v62 = vld [vmem:[%s1961_s5 + $0x40] sm:$0xff] }
 0x2cf   :  { %794 = vmatmul.mubr.f32.gmra.mrb[22].mxu1 %v623_v1  ;;  %v625_v7 = vmax.f32 %v595_v2, 0.0  ;;  %v1073_v1 = vld [vmem:[%s1961_s5 + $0xd0] sm:$0xff]  ;;  %v1074_v2 = vld [vmem:[%s1961_s5 + $0xd8] sm:$0xff]  ;;  %v1578_v3 = vpack.c.bf16 %v1056_v63, %v1055_v62 }
 0x2d0   :  { %v626_v5 = vmax.f32 %v597_v4, 0.0  ;;  %v600_v6 = vpop.f32.mrb[26].mxu0  ;;  %v1580_v4 = vpack.c.bf16 %v1074_v2, %v1073_v1 }
 0x2d1   :  { %v601_v8 = vadd.f32 %v600_v6, %v497_v36  ;;  %v602_v9 = vpop.f32.mrb[27].mxu0  ;;  %v1058_v6 = vld [vmem:[%s1961_s5 + $0x58] sm:$0xff] }
 0x2d2   :  { %v603_v10 = vadd.f32 %v602_v9, %v501_v37  ;;  %799 = vmatprep.mubr.f32.mxu1 %v626_v5  ;;  %v1057_v5 = vld [vmem:[%s1961_s5 + $0x50] sm:$0xff] }
 0x2d3   :  { %800 = vmatmul.mubr.f32.gmra.mrb[24].mxu1 %v625_v7  ;;  %v627_v13 = vmax.f32 %v601_v8, 0.0  ;;  %v1075_v7 = vld [vmem:[%s1961_s5 + $0xe0] sm:$0xff]  ;;  %v1076_v8 = vld [vmem:[%s1961_s5 + $0xe8] sm:$0xff]  ;;  %v1582_v9 = vpack.c.bf16 %v1058_v6, %v1057_v5  ;;  %v1061_v6 = vld [vmem:[%s1961_s5 + $0x70] sm:$0xff] }
 0x2d4   :  { %v628_v11 = vmax.f32 %v603_v10, 0.0  ;;  %v606_v12 = vpop.f32.mrb[28].mxu0  ;;  %v1584_v10 = vpack.c.bf16 %v1076_v8, %v1075_v7  ;;  %v1062_v7 = vld [vmem:[%s1961_s5 + $0x78] sm:$0xff] }
 0x2d5   :  { %v607_v14 = vadd.f32 %v606_v12, %v497_v36  ;;  %v608_v15 = vpop.f32.mrb[29].mxu0  ;;  %v1060_v12 = vld [vmem:[%s1961_s5 + $0x68] sm:$0xff]  ;;  %v1590_v8 = vpack.c.bf16 %v1062_v7, %v1061_v6 }
 0x2d6   :  { %v609_v16 = vadd.f32 %v608_v15, %v501_v37  ;;  %805 = vmatprep.mubr.f32.mxu1 %v628_v11  ;;  %v1059_v11 = vld [vmem:[%s1961_s5 + $0x60] sm:$0xff] }
 0x2d7   :  { %806 = vmatmul.mubr.f32.gmra.mrb[26].mxu1 %v627_v13  ;;  %v629_v18 = vmax.f32 %v607_v14, 0.0  ;;  %v1586_v13 = vpack.c.bf16 %v1060_v12, %v1059_v11  ;;  %v1213_v14 = vld [vmem:[%s1960_s4 + $0x4] sm:$0x3] }
 0x2d8   :  { %v630_v17 = vmax.f32 %v609_v16, 0.0  ;;  %v612_v0 = vpop.f32.mrb[30].mxu0  ;;  %v704_v15 = vrot.slane %v1213_v14, %v1804_v51  ;;  %v708_v16 = vrot.slane %v1213_v14, %v1809_v53 }
 0x2d9   :  { %v613_v19 = vadd.f32 %v612_v0, %v497_v36  ;;  %v614_v20 = vpop.f32.mrb[31].mxu0  ;;  %v1560_v36 = vpack.c.bf16 %v1064_v34, %v1063_v33 }
 0x2da   :  { %v615_v21 = vadd.f32 %v614_v20, %v501_v37  ;;  %811 = vmatprep.mubr.f32.mxu1 %v630_v17  ;;  %v1048_v37 = vld [vmem:[%s1961_s5 + $0x8] sm:$0xff] }
 0x2db   :  { %812 = vmatmul.mubr.f32.gmra.mrb[28].mxu1 %v629_v18  ;;  %v631_v23 = vmax.f32 %v613_v19, 0.0  ;;  %v1562_v40 = vpack.c.bf16 %v1048_v37, %v1047_v35  ;;  %1561 = vmatprep.subr.bf16.mxu1 %v1560_v36 }
 0x2dc   :  { %v632_v22 = vmax.f32 %v615_v21, 0.0 }
 0x2dd   :  { %1563 = vmatpush3.bf16.msra.mxu1 %v1562_v40 }
 0x2de   :  { %817 = vmatprep.mubr.f32.mxu1 %v632_v22  ;;  %1565 = vmatprep.subr.bf16.mxu1 %v1564_v41 }
 0x2df   :  { %818 = vmatmul.mubr.f32.gmra.mrb[30].mxu1 %v631_v23 }
 0x2e1   :  { %1567 = vmatpush3.bf16.msra.mxu1 %v1566_v46 }
 0x2e2   :  { %1569 = vmatprep.subr.bf16.mxu1 %v1568_v47 }
 0x2e5   :  { %1571 = vmatpush3.bf16.msra.mxu1 %v1570_v54 }
 0x2e6   :  { %1573 = vmatprep.subr.bf16.mxu1 %v1572_v55 }
 0x2e9   :  { %1575 = vmatpush3.bf16.msra.mxu1 %v1574_v60 }
 0x2ea   :  { %1577 = vmatprep.subr.bf16.mxu1 %v1576_v61 }
 0x2ed   :  { %1579 = vmatpush3.bf16.msra.mxu1 %v1578_v3  ;;  %v1077_v3 = vld [vmem:[%s1961_s5 + $0xf0] sm:$0xff] }
 0x2ee   :  { %1581 = vmatprep.subr.bf16.mxu1 %v1580_v4  ;;  %v1078_v4 = vld [vmem:[%s1961_s5 + $0xf8] sm:$0xff] }
 0x2ef   :  { %v1588_v5 = vpack.c.bf16 %v1078_v4, %v1077_v3 }
 0x2f1   :  { %1583 = vmatpush3.bf16.msra.mxu1 %v1582_v9  ;;  %v1214_v9 = vld [vmem:[%s1960_s4 + $0x6] sm:$0x3] }
 0x2f2   :  { %1585 = vmatprep.subr.bf16.mxu1 %v1584_v10  ;;  %v911_v10 = vrot.slane %v1214_v9, %v1804_v51  ;;  %v915_v11 = vrot.slane %v1214_v9, %v1809_v53 }
 0x2f5   :  { %1587 = vmatpush3.bf16.msra.mxu1 %v1586_v13 }
 0x2f6   :  { %1589 = vmatprep.subr.bf16.mxu1 %v1588_v5 }
 0x2f9   :  { %1591 = vmatpush3.bf16.msra.mxu1 %v1590_v8 }
 0x396   :  { %v777_v17 = vpop.f32.mrb[16].mxu1 }
 0x397   :  { %v778_v0 = vadd.f32 %v777_v17, %v704_v15  ;;  %v779_v18 = vpop.f32.mrb[17].mxu1 }
 0x398   :  { %v780_v19 = vadd.f32 %v779_v18, %v708_v16 }
 0x399   :  { %v824_v22 = vmax.f32 %v778_v0, 0.0 }
 0x39a   :  { %v825_v20 = vmax.f32 %v780_v19, 0.0  ;;  %v783_v21 = vpop.f32.mrb[18].mxu1 }
 0x39b   :  { %v784_v23 = vadd.f32 %v783_v21, %v704_v15  ;;  %v785_v24 = vpop.f32.mrb[19].mxu1 }
 0x39c   :  { %v786_v25 = vadd.f32 %v785_v24, %v708_v16  ;;  %982 = vmatprep.mubr.f32.mxu0 %v825_v20 }
 0x39d   :  { %983 = vmatmul.mubr.f32.vlgmr.msra.gmra.mrb[32].mxu0 %v824_v22  ;;  %v826_v28 = vmax.f32 %v784_v23, 0.0 }
 0x39e   :  { %v827_v26 = vmax.f32 %v786_v25, 0.0  ;;  %v789_v27 = vpop.f32.mrb[20].mxu1 }
 0x39f   :  { %v790_v29 = vadd.f32 %v789_v27, %v704_v15  ;;  %v791_v30 = vpop.f32.mrb[21].mxu1 }
 0x3a0   :  { %v792_v31 = vadd.f32 %v791_v30, %v708_v16  ;;  %988 = vmatprep.mubr.f32.mxu0 %v827_v26 }
 0x3a1   :  { %989 = vmatmul.mubr.f32.gmra.mrb[34].mxu0 %v826_v28  ;;  %v828_v34 = vmax.f32 %v790_v29, 0.0 }
 0x3a2   :  { %v829_v32 = vmax.f32 %v792_v31, 0.0  ;;  %v795_v33 = vpop.f32.mrb[22].mxu1 }
 0x3a3   :  { %v796_v35 = vadd.f32 %v795_v33, %v704_v15  ;;  %v797_v36 = vpop.f32.mrb[23].mxu1 }
 0x3a4   :  { %v798_v37 = vadd.f32 %v797_v36, %v708_v16  ;;  %994 = vmatprep.mubr.f32.mxu0 %v829_v32 }
 0x3a5   :  { %995 = vmatmul.mubr.f32.gmra.mrb[36].mxu0 %v828_v34  ;;  %v830_v40 = vmax.f32 %v796_v35, 0.0 }
 0x3a6   :  { %v831_v38 = vmax.f32 %v798_v37, 0.0  ;;  %v801_v39 = vpop.f32.mrb[24].mxu1 }
 0x3a7   :  { %v802_v41 = vadd.f32 %v801_v39, %v704_v15  ;;  %v803_v42 = vpop.f32.mrb[25].mxu1 }
 0x3a8   :  { %v804_v43 = vadd.f32 %v803_v42, %v708_v16  ;;  %1000 = vmatprep.mubr.f32.mxu0 %v831_v38 }
 0x3a9   :  { %1001 = vmatmul.mubr.f32.gmra.mrb[38].mxu0 %v830_v40  ;;  %v832_v46 = vmax.f32 %v802_v41, 0.0 }
 0x3aa   :  { %v833_v44 = vmax.f32 %v804_v43, 0.0  ;;  %v807_v45 = vpop.f32.mrb[26].mxu1 }
 0x3ab   :  { %v808_v47 = vadd.f32 %v807_v45, %v704_v15  ;;  %v809_v48 = vpop.f32.mrb[27].mxu1 }
 0x3ac   :  { %v810_v49 = vadd.f32 %v809_v48, %v708_v16  ;;  %1006 = vmatprep.mubr.f32.mxu0 %v833_v44 }
 0x3ad   :  { %1007 = vmatmul.mubr.f32.gmra.mrb[40].mxu0 %v832_v46  ;;  %v834_v54 = vmax.f32 %v808_v47, 0.0 }
 0x3ae   :  { %v835_v50 = vmax.f32 %v810_v49, 0.0  ;;  %v813_v52 = vpop.f32.mrb[28].mxu1 }
 0x3af   :  { %v814_v55 = vadd.f32 %v813_v52, %v704_v15  ;;  %v815_v56 = vpop.f32.mrb[29].mxu1 }
 0x3b0   :  { %v816_v57 = vadd.f32 %v815_v56, %v708_v16  ;;  %1012 = vmatprep.mubr.f32.mxu0 %v835_v50 }
 0x3b1   :  { %1013 = vmatmul.mubr.f32.gmra.mrb[42].mxu0 %v834_v54  ;;  %v836_v60 = vmax.f32 %v814_v55, 0.0 }
 0x3b2   :  { %v837_v58 = vmax.f32 %v816_v57, 0.0  ;;  %v819_v59 = vpop.f32.mrb[30].mxu1 }
 0x3b3   :  { %v820_v61 = vadd.f32 %v819_v59, %v704_v15  ;;  %v821_v62 = vpop.f32.mrb[31].mxu1 }
 0x3b4   :  { %v822_v63 = vadd.f32 %v821_v62, %v708_v16  ;;  %1018 = vmatprep.mubr.f32.mxu0 %v837_v58 }
 0x3b5   :  { %1019 = vmatmul.mubr.f32.gmra.mrb[44].mxu0 %v836_v60  ;;  %v838_v2 = vmax.f32 %v820_v61, 0.0  ;;  %v1215_v60 = vld [vmem:[%s1962_s6] ss:$0 sm:$0xff] }
 0x3b6   :  { %v839_v1 = vmax.f32 %v822_v63, 0.0 }
 0x3b8   :  { %1024 = vmatprep.mubr.f32.mxu0 %v839_v1 }
 0x3b9   :  { %1025 = vmatmul.mubr.f32.gmra.mrb[46].mxu0 %v838_v2 }
 0x470   :  { %v984_v12 = vpop.f32.mrb[32].mxu0 }
 0x471   :  { %v985_v13 = vadd.f32 %v984_v12, %v911_v10  ;;  %v986_v14 = vpop.f32.mrb[33].mxu0 }
 0x472   :  { %v987_v15 = vadd.f32 %v986_v14, %v915_v11 }
 0x473   :  { %v1031_v0 = vmax.f32 %v985_v13, 0.0 }
 0x474   :  { %v1032_v16 = vmax.f32 %v987_v15, 0.0  ;;  %v990_v17 = vpop.f32.mrb[34].mxu0 }
 0x475   :  { %v991_v18 = vadd.f32 %v990_v17, %v911_v10  ;;  %v992_v19 = vpop.f32.mrb[35].mxu0 }
 0x476   :  { %v993_v20 = vadd.f32 %v992_v19, %v915_v11  ;;  %1150 = vmatprep.mubr.f32.mxu1 %v1032_v16 }
 0x477   :  { %1151 = vmatmul.mubr.f32.vlgmr.msra.gmra.mrb[32].mxu1 %v1031_v0  ;;  %v1033_v23 = vmax.f32 %v991_v18, 0.0 }
 0x478   :  { %v1034_v21 = vmax.f32 %v993_v20, 0.0  ;;  %v996_v22 = vpop.f32.mrb[36].mxu0 }
 0x479   :  { %v997_v24 = vadd.f32 %v996_v22, %v911_v10  ;;  %v998_v25 = vpop.f32.mrb[37].mxu0 }
 0x47a   :  { %v999_v51 = vadd.f32 %v998_v25, %v915_v11  ;;  %1155 = vmatprep.mubr.f32.mxu1 %v1034_v21 }
 0x47b   :  { %1156 = vmatmul.mubr.f32.gmra.mrb[34].mxu1 %v1033_v23  ;;  %v1035_v27 = vmax.f32 %v997_v24, 0.0 }
 0x47c   :  { %v1036_v53 = vmax.f32 %v999_v51, 0.0  ;;  %v1002_v26 = vpop.f32.mrb[38].mxu0 }
 0x47d   :  { %v1003_v28 = vadd.f32 %v1002_v26, %v911_v10  ;;  %v1004_v29 = vpop.f32.mrb[39].mxu0 }
 0x47e   :  { %v1005_v30 = vadd.f32 %v1004_v29, %v915_v11  ;;  %1160 = vmatprep.mubr.f32.mxu1 %v1036_v53 }
 0x47f   :  { %1161 = vmatmul.mubr.f32.gmra.mrb[36].mxu1 %v1035_v27  ;;  %v1037_v33 = vmax.f32 %v1003_v28, 0.0 }
 0x480   :  { %v1038_v31 = vmax.f32 %v1005_v30, 0.0  ;;  %v1008_v32 = vpop.f32.mrb[40].mxu0 }
 0x481   :  { %v1009_v34 = vadd.f32 %v1008_v32, %v911_v10  ;;  %v1010_v35 = vpop.f32.mrb[41].mxu0 }
 0x482   :  { %v1011_v36 = vadd.f32 %v1010_v35, %v915_v11  ;;  %1165 = vmatprep.mubr.f32.mxu1 %v1038_v31 }
 0x483   :  { %1166 = vmatmul.mubr.f32.gmra.mrb[38].mxu1 %v1037_v33  ;;  %v1039_v39 = vmax.f32 %v1009_v34, 0.0 }
 0x484   :  { %v1040_v37 = vmax.f32 %v1011_v36, 0.0  ;;  %v1014_v38 = vpop.f32.mrb[42].mxu0 }
 0x485   :  { %v1015_v40 = vadd.f32 %v1014_v38, %v911_v10  ;;  %v1016_v41 = vpop.f32.mrb[43].mxu0 }
 0x486   :  { %v1017_v42 = vadd.f32 %v1016_v41, %v915_v11  ;;  %1170 = vmatprep.mubr.f32.mxu1 %v1040_v37 }
 0x487   :  { %1171 = vmatmul.mubr.f32.gmra.mrb[40].mxu1 %v1039_v39  ;;  %v1041_v45 = vmax.f32 %v1015_v40, 0.0 }
 0x488   :  { %v1042_v43 = vmax.f32 %v1017_v42, 0.0  ;;  %v1020_v44 = vpop.f32.mrb[44].mxu0 }
 0x489   :  { %v1021_v46 = vadd.f32 %v1020_v44, %v911_v10  ;;  %v1022_v47 = vpop.f32.mrb[45].mxu0 }
 0x48a   :  { %v1023_v48 = vadd.f32 %v1022_v47, %v915_v11  ;;  %1175 = vmatprep.mubr.f32.mxu1 %v1042_v43 }
 0x48b   :  { %1176 = vmatmul.mubr.f32.gmra.mrb[42].mxu1 %v1041_v45  ;;  %v1043_v52 = vmax.f32 %v1021_v46, 0.0 }
 0x48c   :  { %v1044_v49 = vmax.f32 %v1023_v48, 0.0  ;;  %v1026_v50 = vpop.f32.mrb[46].mxu0 }
 0x48d   :  { %v1027_v54 = vadd.f32 %v1026_v50, %v911_v10  ;;  %v1028_v55 = vpop.f32.mrb[47].mxu0 }
 0x48e   :  { %v1029_v56 = vadd.f32 %v1028_v55, %v915_v11  ;;  %1180 = vmatprep.mubr.f32.mxu1 %v1044_v49 }
 0x48f   :  { %1181 = vmatmul.mubr.f32.gmra.mrb[44].mxu1 %v1043_v52  ;;  %v1045_v58 = vmax.f32 %v1027_v54, 0.0 }
 0x490   :  { %v1046_v57 = vmax.f32 %v1029_v56, 0.0 }
 0x492   :  { %1185 = vmatprep.mubr.f32.mxu1 %v1046_v57 }
 0x493   :  { %1186 = vmatmul.mubr.f32.gmra.mrb[46].mxu1 %v1045_v58 }
 0x54a   :  { %v1248_v59 = vpop.f32.mrb[32].mxu1 }
 0x54b   :  { %v1249_v61 = vpop.f32.mrb[33].mxu1 }
 0x54c   :  { %v1250_v62 = vadd.f32 %v1249_v61, %v1248_v59 }
 0x54e   :  { %v1153_v63 = vadd.f32 %v1250_v62, %v1215_v60  ;;  %v1251_v1 = vpop.f32.mrb[34].mxu1 }
 0x54f   :  { %v1252_v2 = vpop.f32.mrb[35].mxu1 }
 0x550   :  { %v1191_v3 = vmax.f32 %v1153_v63, 0.0  ;;  %v1253_v4 = vadd.f32 %v1252_v2, %v1251_v1 }
 0x552   :  { %1199 = vst [vmem:[%s1963_s7] sm:$0xff] %v1191_v3  ;;  %v1158_v5 = vadd.f32 %v1253_v4, %v1215_v60  ;;  %v1254_v6 = vpop.f32.mrb[36].mxu1 }
 0x553   :  { %v1255_v7 = vpop.f32.mrb[37].mxu1 }
 0x554   :  { %v1192_v8 = vmax.f32 %v1158_v5, 0.0  ;;  %v1256_v9 = vadd.f32 %v1255_v7, %v1254_v6 }
 0x556   :  { %1200 = vst [vmem:[%s1963_s7 + $0x8] sm:$0xff] %v1192_v8  ;;  %v1163_v10 = vadd.f32 %v1256_v9, %v1215_v60  ;;  %v1257_v11 = vpop.f32.mrb[38].mxu1 }
 0x557   :  { %v1258_v12 = vpop.f32.mrb[39].mxu1 }
 0x558   :  { %v1193_v13 = vmax.f32 %v1163_v10, 0.0  ;;  %v1259_v14 = vadd.f32 %v1258_v12, %v1257_v11 }
 0x55a   :  { %1201 = vst [vmem:[%s1963_s7 + $0x10] sm:$0xff] %v1193_v13  ;;  %v1168_v15 = vadd.f32 %v1259_v14, %v1215_v60  ;;  %v1260_v16 = vpop.f32.mrb[40].mxu1 }
 0x55b   :  { %v1261_v17 = vpop.f32.mrb[41].mxu1 }
 0x55c   :  { %v1194_v0 = vmax.f32 %v1168_v15, 0.0  ;;  %v1262_v18 = vadd.f32 %v1261_v17, %v1260_v16 }
 0x55e   :  { %1202 = vst [vmem:[%s1963_s7 + $0x18] sm:$0xff] %v1194_v0  ;;  %v1173_v19 = vadd.f32 %v1262_v18, %v1215_v60  ;;  %v1263_v20 = vpop.f32.mrb[42].mxu1 }
 0x55f   :  { %v1264_v21 = vpop.f32.mrb[43].mxu1 }
 0x560   :  { %v1195_v22 = vmax.f32 %v1173_v19, 0.0  ;;  %v1265_v23 = vadd.f32 %v1264_v21, %v1263_v20 }
 0x562   :  { %1203 = vst [vmem:[%s1963_s7 + $0x20] sm:$0xff] %v1195_v22  ;;  %v1178_v24 = vadd.f32 %v1265_v23, %v1215_v60  ;;  %v1266_v25 = vpop.f32.mrb[44].mxu1 }
 0x563   :  { %v1267_v51 = vpop.f32.mrb[45].mxu1 }
 0x564   :  { %v1196_v53 = vmax.f32 %v1178_v24, 0.0  ;;  %v1268_v26 = vadd.f32 %v1267_v51, %v1266_v25 }
 0x566   :  { %1204 = vst [vmem:[%s1963_s7 + $0x28] sm:$0xff] %v1196_v53  ;;  %v1183_v27 = vadd.f32 %v1268_v26, %v1215_v60  ;;  %v1269_v28 = vpop.f32.mrb[46].mxu1 }
 0x567   :  { %v1270_v29 = vpop.f32.mrb[47].mxu1 }
 0x568   :  { %v1197_v30 = vmax.f32 %v1183_v27, 0.0  ;;  %v1271_v31 = vadd.f32 %v1270_v29, %v1269_v28 }
 0x56a   :  { %1205 = vst [vmem:[%s1963_s7 + $0x30] sm:$0xff] %v1197_v30  ;;  %v1188_v32 = vadd.f32 %v1271_v31, %v1215_v60 }
 0x56c   :  { %v1198_v33 = vmax.f32 %v1188_v32, 0.0 }
 0x56e   :  { %1206 = vst [vmem:[%s1963_s7 + $0x38] sm:$0xff] %v1198_v33 }
 0x56f   :  { %1211 = vsyncpa [#allocation3], 1 }

</bundles_post_ra>
